<compile_context>
chip_gen: v5e
topology: v5e:2x2
jax: 0.10.0
libtpu: 0.0.40
codegen_flags: <defaults>
</compile_context>

<pallas_src>
import functools

import jax
import jax.numpy as jnp
from jax.experimental import pallas as pl
from jax.experimental.pallas import tpu as pltpu

LN_EPS = 1e-5


def _round_up(x, m):
    return (x + m - 1) // m * m


def _vmem_capacity_bytes():
    try:
        return int(pltpu.get_tpu_info().vmem_capacity_bytes)
    except Exception:
        return 64 * 2**20  # conservative: v7x per-TensorCore VMEM


def _lens_kernel(h_ref, wt_ref, bt_ref, g_ref, be_ref, wu_ref, out_ref, x_ref):
    """One (row-tile, proj-tile) step of the CLIPTunedLens forward.

    h_ref  : (tm, D)  hidden-state row tile (input dtype, residual read in f32)
    wt_ref : (D, D)   translator weight, transposed (compute dtype)
    bt_ref : (1, D)   translator bias, f32
    g_ref  : (1, D)   final-LN gamma, f32
    be_ref : (1, D)   final-LN beta, f32
    wu_ref : (D, tn)  unembed projection tile (compute dtype)
    out_ref: (tm, tn) logits tile
    x_ref  : (tm, D)  VMEM scratch: post-LayerNorm rows (compute dtype),
                      computed once per row tile and reused across proj tiles.
    """
    j = pl.program_id(1)

    @pl.when(j == 0)
    def _():
        h = h_ref[...].astype(jnp.float32)
        # translator: h @ W_t^T (bf16/f32 MXU, f32 accumulation)
        hp = jnp.dot(h.astype(wt_ref.dtype), wt_ref[...],
                     preferred_element_type=jnp.float32)
        # explicit residual + bias in f32 (avoids bf16 rounding of "+ I")
        hp = hp + h + bt_ref[...]
        # final LayerNorm in f32
        mean = jnp.mean(hp, axis=-1, keepdims=True)
        cent = hp - mean
        var = jnp.mean(cent * cent, axis=-1, keepdims=True)
        x = cent * jax.lax.rsqrt(var + LN_EPS) * g_ref[...] + be_ref[...]
        x_ref[...] = x.astype(x_ref.dtype)

    # unembed projection tile (f32 accumulation on the MXU)
    out_ref[...] = jnp.dot(
        x_ref[...], wu_ref[...], preferred_element_type=jnp.float32
    ).astype(out_ref.dtype)


@functools.partial(jax.jit, static_argnames=("tm", "tn", "compute_dtype"))
def clip_tuned_lens_forward(h, w_t, b_t, ln_gamma, ln_beta, w_u, *,
                            tm=None, tn=None, compute_dtype=jnp.bfloat16):
    """h: (B, S, D). Translator params already selected for the (static) layer idx."""
    B, S, D = h.shape
    Dp = w_u.shape[1]
    N = B * S
    cdt = jnp.dtype(compute_dtype)
    cbytes = cdt.itemsize
    hbytes = jnp.dtype(h.dtype).itemsize
    obytes = hbytes  # output dtype == input dtype

    vmem_cap = _vmem_capacity_bytes()

    # ---- tile selection ------------------------------------------------------
    lane = 128
    Dp128 = _round_up(Dp, lane)
    if tn is None:
        # Keep the whole projection matrix resident when it comfortably fits
        # VMEM: the W_U BlockSpec index becomes constant and it is DMA'd once.
        wu_resident_budget = min(16 * 2**20, vmem_cap // 5)
        if D * Dp128 * cbytes <= wu_resident_budget:
            tn = Dp128
        else:
            tn = min(512, Dp128)
    assert tn % lane == 0, "tn must be a multiple of 128"
    Dpp = _round_up(Dp, tn)

    if tm is None:
        n128 = _round_up(N, lane)
        if n128 <= 256:
            tm = n128
        elif n128 <= 2048:
            # two balanced row tiles -> both v7x TensorCores stay busy
            tm = _round_up(pl.cdiv(N, 2), lane)
        else:
            tm = 512
        # cap tm so h tile + x scratch + f32 LN temps + out tile fit ~1/3 VMEM
        per_row = D * (2 * hbytes + cbytes + 3 * 4) + 2 * tn * obytes
        tm_cap = max(lane, (vmem_cap // 3) // per_row // lane * lane)
        tm = min(tm, tm_cap)
    assert tm % lane == 0, "tm must be a multiple of 128"
    Np = _round_up(N, tm)

    grid_i, grid_j = Np // tm, Dpp // tn
    grid = (grid_i, grid_j)

    # ---- wrapper-side prep (no heavy folds; just layout/dtype) ---------------
    wt = w_t.astype(jnp.float32).T.astype(cdt)          # (D, D) transposed
    wu = w_u.astype(cdt)                                 # (D, Dp)
    bt2 = b_t.reshape(1, D).astype(jnp.float32)
    g2 = ln_gamma.reshape(1, D).astype(jnp.float32)
    be2 = ln_beta.reshape(1, D).astype(jnp.float32)

    h2 = h.reshape(N, D)
    if Np != N:
        h2 = jnp.pad(h2, ((0, Np - N), (0, 0)))
    if Dpp != Dp:
        wu = jnp.pad(wu, ((0, 0), (0, Dpp - Dp)))

    # ---- BlockSpecs ----------------------------------------------------------
    def _spec(shape, index_map, mode=None):
        if mode is None:
            return pl.BlockSpec(shape, index_map)
        return pl.BlockSpec(shape, index_map, pipeline_mode=mode)

    one_buf = pl.Buffered(1)   # grid-invariant operands: single-buffer them

    if grid_j == 1:
        wu_map = lambda i, j: (0, 0)
        out_map = lambda i, j: (i, 0)
        wu_mode = one_buf                 # constant block -> DMA'd exactly once
    else:
        nj = grid_j

        def _snake(i, j):
            # serpentine over the projection axis: reverse j on odd row tiles
            # so the boundary W_U tile stays resident across the i transition.
            odd = i % 2
            return (1 - 2 * odd) * j + odd * (nj - 1)

        wu_map = lambda i, j: (0, _snake(i, j))
        out_map = lambda i, j: (i, _snake(i, j))
        wu_mode = None                    # streamed -> keep double-buffering

    in_specs = [
        _spec((tm, D), lambda i, j: (i, 0)),                 # h row tile
        _spec((D, D), lambda i, j: (0, 0), one_buf),         # W_t^T (invariant)
        _spec((1, D), lambda i, j: (0, 0), one_buf),         # b_t    (invariant)
        _spec((1, D), lambda i, j: (0, 0), one_buf),         # gamma  (invariant)
        _spec((1, D), lambda i, j: (0, 0), one_buf),         # beta   (invariant)
        _spec((D, tn), wu_map, wu_mode),                     # W_U tile
    ]
    out_specs = pl.BlockSpec((tm, tn), out_map)

    # ---- VMEM budget (incl. f32 LN intermediates) & generation-aware cap -----
    wu_bufs = 1 if grid_j == 1 else 2
    vmem_need = (
        2 * tm * D * hbytes          # h tile (double-buffered)
        + D * D * cbytes             # W_t (single-buffered, invariant)
        + 3 * D * 4                  # b_t, gamma, beta
        + wu_bufs * D * tn * cbytes  # W_U tile(s)
        + 2 * tm * tn * obytes       # output tile (double-buffered)
        + tm * D * cbytes            # x scratch
        + 3 * tm * D * 4             # f32 LN intermediates live at j == 0
    )
    vmem_limit = int(min(int(0.9 * vmem_cap),
                         max(int(1.3 * vmem_need), 32 * 2**20)))

    # ---- advisory cost estimate (actual streamed bytes) ----------------------
    wu_passes = 1 if grid_j == 1 else grid_i
    cost = pl.CostEstimate(
        flops=2 * Np * D * D + 2 * Np * D * Dpp,
        transcendentals=Np,
        bytes_accessed=int(
            Np * D * hbytes                  # h read once
            + D * D * cbytes                 # W_t read once (resident)
            + wu_passes * D * Dpp * cbytes   # W_U streamed per row tile (or once)
            + Np * Dpp * obytes              # logits written once
            + 3 * D * 4
        ),
    )

    out = pl.pallas_call(
        _lens_kernel,
        out_shape=jax.ShapeDtypeStruct((Np, Dpp), h.dtype),
        grid_spec=pltpu.PrefetchScalarGridSpec(
            num_scalar_prefetch=0,
            grid=grid,
            in_specs=in_specs,
            out_specs=out_specs,
            scratch_shapes=[pltpu.VMEM((tm, D), cdt)],
        ),
        compiler_params=pltpu.CompilerParams(
            dimension_semantics=("parallel", "arbitrary"),
            vmem_limit_bytes=vmem_limit,
        ),
        cost_estimate=cost,
    )(h2, wt, bt2, g2, be2, wu)

    if Np != N or Dpp != Dp:      # slice only when padding was actually added
        out = out[:N, :Dp]
    return out.reshape(B, S, Dp)


def _reference(h, w_t, b_t, ln_gamma, ln_beta, w_u):
    """Pure-JAX reference of the same forward pass (high-precision matmuls)."""
    hp = h + (jnp.einsum("bsd,ed->bse", h, w_t,
                         precision=jax.lax.Precision.HIGHEST) + b_t)
    mean = jnp.mean(hp, axis=-1, keepdims=True)
    var = jnp.mean((hp - mean) ** 2, axis=-1, keepdims=True)
    x = (hp - mean) * jax.lax.rsqrt(var + LN_EPS)
    x = x * ln_gamma + ln_beta
    return jnp.einsum("bsd,dp->bsp", x, w_u,
                      precision=jax.lax.Precision.HIGHEST)


if __name__ == "__main__":
    key = jax.random.PRNGKey(0)
    k_h, k_w, k_b, k_g, k_be, k_u = jax.random.split(key, 6)

    # Small-but-representative shapes.  N = batch*seq is deliberately NOT a
    # multiple of the row tile and d_proj is NOT a multiple of the lane tile,
    # to exercise the padding / slicing path.
    batch, seq, d_model, d_proj = 2, 300, 128, 320
    num_hidden_layers = 4
    idx = 2  # which layer translator to use (static int, as in torch forward)

    h = jax.random.normal(k_h, (batch, seq, d_model), dtype=jnp.float32)

    # Stacked translator parameters (reference __init__ zero-inits these; use
    # small random values so the kernel path is actually exercised).
    w_all = 0.02 * jax.random.normal(
        k_w, (num_hidden_layers, d_model, d_model), dtype=jnp.float32)
    b_all = 0.02 * jax.random.normal(
        k_b, (num_hidden_layers, d_model), dtype=jnp.float32)

    # Unembed parameters (CLIP final LayerNorm + projection).
    ln_gamma = 1.0 + 0.05 * jax.random.normal(k_g, (d_model,), jnp.float32)
    ln_beta = 0.05 * jax.random.normal(k_be, (d_model,), jnp.float32)
    w_u = jax.random.normal(k_u, (d_model, d_proj), jnp.float32) / jnp.sqrt(d_model)

    # Layer selection (static, as in the torch module) is wrapper glue.
    w_t, b_t = w_all[idx], b_all[idx]

    ref = _reference(h, w_t, b_t, ln_gamma, ln_beta, w_u)

    # 1) default path: bf16 matmuls, auto tiles (W_U resident, 2 row tiles).
    out = clip_tuned_lens_forward(h, w_t, b_t, ln_gamma, ln_beta, w_u)
    out = jax.block_until_ready(out)
    assert out.shape == (batch, seq, d_proj)
    assert jnp.allclose(out, ref, atol=1e-1, rtol=1e-1), "bf16 mismatch vs reference"

    # 2) f32 compute path (tight tolerance).
    out_f32 = clip_tuned_lens_forward(h, w_t, b_t, ln_gamma, ln_beta, w_u,
                                      compute_dtype=jnp.float32)
    out_f32 = jax.block_until_ready(out_f32)
    assert out_f32.shape == (batch, seq, d_proj)
    assert jnp.allclose(out_f32, ref, atol=2e-3, rtol=2e-3), "f32 mismatch vs reference"

    # 3) forced small tiles: exercises the streamed-W_U + serpentine path.
    out_tiled = clip_tuned_lens_forward(h, w_t, b_t, ln_gamma, ln_beta, w_u,
                                        tm=256, tn=128,
                                        compute_dtype=jnp.bfloat16)
    out_tiled = jax.block_until_ready(out_tiled)
    assert out_tiled.shape == (batch, seq, d_proj)
    assert jnp.allclose(out_tiled, ref, atol=1e-1, rtol=1e-1), \
        "tiled bf16 mismatch vs reference"

    print("KERNEL_OK")
</pallas_src>

<mosaic_0001>
module attributes {stable_mosaic.version = 11 : i64} {
  func.func @_lens_kernel(%arg0: i32, %arg1: i32, %arg2: memref<384x128xf32, #tpu.memory_space<vmem>>, %arg3: memref<128x128xbf16, #tpu.memory_space<vmem>>, %arg4: memref<1x128xf32, #tpu.memory_space<vmem>>, %arg5: memref<1x128xf32, #tpu.memory_space<vmem>>, %arg6: memref<1x128xf32, #tpu.memory_space<vmem>>, %arg7: memref<128x384xbf16, #tpu.memory_space<vmem>>, %arg8: memref<384x384xf32, #tpu.memory_space<vmem>>, %arg9: memref<384x128xbf16, #tpu.memory_space<vmem>>) attributes {dimension_semantics = [#tpu.dimension_semantics<parallel>, #tpu.dimension_semantics<arbitrary>], iteration_bounds = array<i64: 2, 1>, scalar_prefetch = 0 : i64, scratch_operands = 1 : i64, tpu.core_type = #tpu.core_type<tc>, window_params = [{transform_indices = @transform_0, window_bounds = array<i64: 384, 128>}, {pipeline_mode = #tpu.pipeline_mode<synchronous>, transform_indices = @transform_1, window_bounds = array<i64: 128, 128>}, {pipeline_mode = #tpu.pipeline_mode<synchronous>, transform_indices = @transform_2, window_bounds = array<i64: 1, 128>}, {pipeline_mode = #tpu.pipeline_mode<synchronous>, transform_indices = @transform_3, window_bounds = array<i64: 1, 128>}, {pipeline_mode = #tpu.pipeline_mode<synchronous>, transform_indices = @transform_4, window_bounds = array<i64: 1, 128>}, {pipeline_mode = #tpu.pipeline_mode<synchronous>, transform_indices = @transform_5, window_bounds = array<i64: 128, 384>}, {transform_indices = @transform_6, window_bounds = array<i64: 384, 384>}]} {
    %c0_i32 = arith.constant 0 : i32
    %0 = arith.cmpi eq, %arg1, %c0_i32 : i32
    %1 = arith.extui %0 : i1 to i32
    %c0_i32_0 = arith.constant 0 : i32
    %2 = arith.cmpi ne, %1, %c0_i32_0 : i32
    scf.if %2 {
      %c0_6 = arith.constant 0 : index
      %c0_7 = arith.constant 0 : index
      %7 = vector.load %arg2[%c0_6, %c0_7] : memref<384x128xf32, #tpu.memory_space<vmem>>, vector<384x128xf32>
      %8 = arith.truncf %7 : vector<384x128xf32> to vector<384x128xbf16>
      %c0_8 = arith.constant 0 : index
      %c0_9 = arith.constant 0 : index
      %9 = vector.load %arg3[%c0_8, %c0_9] : memref<128x128xbf16, #tpu.memory_space<vmem>>, vector<128x128xbf16>
      %cst_10 = arith.constant dense<0.000000e+00> : vector<384x128xf32>
      %10 = tpu.matmul %8, %9, %cst_10 {dimension_numbers = #tpu.dot_dimension_numbers<[1], [0], [0], [1], [0, 0, 1, 1], [], []>} : vector<384x128xbf16>, vector<128x128xbf16>, vector<384x128xf32> -> vector<384x128xf32>
      %11 = arith.addf %10, %7 : vector<384x128xf32>
      %c0_11 = arith.constant 0 : index
      %c0_12 = arith.constant 0 : index
      %12 = vector.load %arg4[%c0_11, %c0_12] : memref<1x128xf32, #tpu.memory_space<vmem>>, vector<1x128xf32>
      %13 = vector.broadcast %12 : vector<1x128xf32> to vector<384x128xf32>
      %14 = arith.addf %11, %13 : vector<384x128xf32>
      %cst_13 = arith.constant dense<0.000000e+00> : vector<384xf32>
      %15 = vector.multi_reduction <add>, %14, %cst_13 [1] : vector<384x128xf32> to vector<384xf32>
      %16 = vector.shape_cast %15 : vector<384xf32> to vector<384x1xf32>
      %cst_14 = arith.constant 1.280000e+02 : f32
      %17 = vector.broadcast %cst_14 : f32 to vector<384x1xf32>
      %18 = arith.divf %16, %17 : vector<384x1xf32>
      %19 = vector.broadcast %18 : vector<384x1xf32> to vector<384x128xf32>
      %20 = arith.subf %14, %19 : vector<384x128xf32>
      %21 = arith.mulf %20, %20 : vector<384x128xf32>
      %cst_15 = arith.constant dense<0.000000e+00> : vector<384xf32>
      %22 = vector.multi_reduction <add>, %21, %cst_15 [1] : vector<384x128xf32> to vector<384xf32>
      %23 = vector.shape_cast %22 : vector<384xf32> to vector<384x1xf32>
      %cst_16 = arith.constant 1.280000e+02 : f32
      %24 = vector.broadcast %cst_16 : f32 to vector<384x1xf32>
      %25 = arith.divf %23, %24 : vector<384x1xf32>
      %cst_17 = arith.constant 9.99999974E-6 : f32
      %26 = vector.broadcast %cst_17 : f32 to vector<384x1xf32>
      %27 = arith.addf %25, %26 : vector<384x1xf32>
      %28 = math.rsqrt %27 : vector<384x1xf32>
      %29 = vector.broadcast %28 : vector<384x1xf32> to vector<384x128xf32>
      %30 = arith.mulf %20, %29 : vector<384x128xf32>
      %c0_18 = arith.constant 0 : index
      %c0_19 = arith.constant 0 : index
      %31 = vector.load %arg5[%c0_18, %c0_19] : memref<1x128xf32, #tpu.memory_space<vmem>>, vector<1x128xf32>
      %32 = vector.broadcast %31 : vector<1x128xf32> to vector<384x128xf32>
      %33 = arith.mulf %30, %32 : vector<384x128xf32>
      %c0_20 = arith.constant 0 : index
      %c0_21 = arith.constant 0 : index
      %34 = vector.load %arg6[%c0_20, %c0_21] : memref<1x128xf32, #tpu.memory_space<vmem>>, vector<1x128xf32>
      %35 = vector.broadcast %34 : vector<1x128xf32> to vector<384x128xf32>
      %36 = arith.addf %33, %35 : vector<384x128xf32>
      %37 = arith.truncf %36 : vector<384x128xf32> to vector<384x128xbf16>
      %c0_22 = arith.constant 0 : index
      %c0_23 = arith.constant 0 : index
      %38 = vector.load %arg9[%c0_22, %c0_23] : memref<384x128xbf16, #tpu.memory_space<vmem>>, vector<384x128xbf16>
      tpu.vector_store %arg9[%c0_22, %c0_23], %37 {strides = array<i32>} : memref<384x128xbf16, #tpu.memory_space<vmem>>, vector<384x128xbf16>,
    } else {
    }
    %c0 = arith.constant 0 : index
    %c0_1 = arith.constant 0 : index
    %3 = vector.load %arg9[%c0, %c0_1] : memref<384x128xbf16, #tpu.memory_space<vmem>>, vector<384x128xbf16>
    %c0_2 = arith.constant 0 : index
    %c0_3 = arith.constant 0 : index
    %4 = vector.load %arg7[%c0_2, %c0_3] : memref<128x384xbf16, #tpu.memory_space<vmem>>, vector<128x384xbf16>
    %cst = arith.constant dense<0.000000e+00> : vector<384x384xf32>
    %5 = tpu.matmul %3, %4, %cst {dimension_numbers = #tpu.dot_dimension_numbers<[1], [0], [0], [1], [0, 0, 1, 1], [], []>} : vector<384x128xbf16>, vector<128x384xbf16>, vector<384x384xf32> -> vector<384x384xf32>
    %c0_4 = arith.constant 0 : index
    %c0_5 = arith.constant 0 : index
    %6 = vector.load %arg8[%c0_4, %c0_5] : memref<384x384xf32, #tpu.memory_space<vmem>>, vector<384x384xf32>
    tpu.vector_store %arg8[%c0_4, %c0_5], %5 {strides = array<i32>} : memref<384x384xf32, #tpu.memory_space<vmem>>, vector<384x384xf32>,
    return
  }
  func.func @transform_0(%arg0: i32, %arg1: i32) -> (i32, i32) {
    %c0_i32 = arith.constant 0 : i32
    %c0_i32_0 = arith.constant 0 : i32
    return %arg0, %c0_i32 : i32, i32
  }
  func.func @transform_1(%arg0: i32, %arg1: i32) -> (i32, i32) {
    %c0_i32 = arith.constant 0 : i32
    %c0_i32_0 = arith.constant 0 : i32
    %c0_i32_1 = arith.constant 0 : i32
    return %c0_i32, %c0_i32_0 : i32, i32
  }
  func.func @transform_2(%arg0: i32, %arg1: i32) -> (i32, i32) {
    %c0_i32 = arith.constant 0 : i32
    %c0_i32_0 = arith.constant 0 : i32
    %c0_i32_1 = arith.constant 0 : i32
    return %c0_i32, %c0_i32_0 : i32, i32
  }
  func.func @transform_3(%arg0: i32, %arg1: i32) -> (i32, i32) {
    %c0_i32 = arith.constant 0 : i32
    %c0_i32_0 = arith.constant 0 : i32
    %c0_i32_1 = arith.constant 0 : i32
    return %c0_i32, %c0_i32_0 : i32, i32
  }
  func.func @transform_4(%arg0: i32, %arg1: i32) -> (i32, i32) {
    %c0_i32 = arith.constant 0 : i32
    %c0_i32_0 = arith.constant 0 : i32
    %c0_i32_1 = arith.constant 0 : i32
    return %c0_i32, %c0_i32_0 : i32, i32
  }
  func.func @transform_5(%arg0: i32, %arg1: i32) -> (i32, i32) {
    %c0_i32 = arith.constant 0 : i32
    %c0_i32_0 = arith.constant 0 : i32
    %c0_i32_1 = arith.constant 0 : i32
    return %c0_i32, %c0_i32_0 : i32, i32
  }
  func.func @transform_6(%arg0: i32, %arg1: i32) -> (i32, i32) {
    %c0_i32 = arith.constant 0 : i32
    %c0_i32_0 = arith.constant 0 : i32
    return %arg0, %c0_i32 : i32, i32
  }
}

</mosaic_0001>

<bundles_post_ra>
// kernel: clip_tuned_lens_forward.1
= control target key start
LH: loop header
LB: loop body
LE: loop exit
PB: predicated region body
PF: predicated region fallthrough
CT: control target
= control target key end

     0   :  { %s3332_s21 = smov 0   ;;  %s3334_s22 = smov 0   ;;  %s4800_s0 = inlined_call_operand.vmem [shape: f32[768,128], index: 0, kind: input, shape index: {}]   ;;  %s4801_s1 = inlined_call_operand.vmem [shape: bf16[128,128], index: 1, kind: input, shape index: {}]   ;;  %s4802_s2 = inlined_call_operand.vmem [shape: f32[1,128], index: 2, kind: input, shape index: {}]   ;;  %s4803_s3 = inlined_call_operand.vmem [shape: f32[1,128], index: 3, kind: input, shape index: {}]   ;;  %s4804_s4 = inlined_call_operand.vmem [shape: f32[1,128], index: 4, kind: input, shape index: {}]   ;;  %s4805_s5 = inlined_call_operand.vmem [shape: bf16[128,384], index: 5, kind: input, shape index: {}]   ;;  %s4806_s6 = inlined_call_operand.vmem [shape: f32[768,384], index: 6, kind: output, shape index: {}]  }
   0x1   :  { %s3336_s23 = smov 0  }
   0x2 LB: > { %s28_s24 = sadd.s32 1, %s3290_s22  ;;  %p2711_p0 = scmp.ge.s32.totalorder %s3294_s23, 1  ;;  %s3294_s23 = sphi %s3336_s23, %s16_s23   ;;  %s3290_s22 = sphi %s3334_s22, %s4818_s22   ;;  %s3286_s21 = sphi %s3332_s21, %s4817_s21  }
   0x3   : > { %p30_p1 = scmp.ge.s32.totalorder %s28_s24, 2  ;;  %p225_p2 = scmp.lt.s32.totalorder %s3294_s23, 3 }
   0x5   : > { %s4820_s24 = smov (%p30_p1, %s28_s24), 0  ;;  %p226_p3 = pnand %p2711_p0, %p225_p2 }
   0x6   : > { %s256_s7 = smul.u32 (!%p226_p3), 48, %s3286_s21 }
   0x7   : > { %229 = sbr.rel (%p226_p3) target bundleno = 1412 (0x584), region = 44 }
   0x8   : > { %p257_p4 = scmp.lt.s32.totalorder (!%p226_p3), %s256_s7, 95 }
   0xc   : > { %v2947_v0 = vld [vmem:[%s4801_s1 + $0x38] sm:$0xff]  ;;  %v2946_v1 = vld [vmem:[%s4801_s1 + $0x30] sm:$0xff]  ;;  %v2945_v2 = vld [vmem:[%s4801_s1 + $0x28] sm:$0xff]  ;;  %s4822_s7 = smov (!%p257_p4, %s256_s7), 95  ;;  %v3296_v54 = vmov 128.0  }
   0xd   : > { %409 = vmatpush.bf16.msra.mxu0 %v2947_v0  ;;  %v2944_v3 = vld [vmem:[%s4801_s1 + $0x20] sm:$0xff]  ;;  %v2943_v4 = vld [vmem:[%s4801_s1 + $0x18] sm:$0xff]  ;;  %v2942_v5 = vld [vmem:[%s4801_s1 + $0x10] sm:$0xff]  ;;  %s2712_s14 = sshll.u32 %s4822_s7, 3  ;;  %3168 = vrcp.f32 %v3296_v54  ;;  %s3139_s11 = smul.u32 24, %s4822_s7 }
   0xe   : > { %v2941_v6 = vld [vmem:[%s4801_s1 + $0x8] sm:$0xff]  ;;  %s3377_s19 = scalar_lea.vmem %s4800_s0, %s2712_s14  ;;  %v2940_v7 = vld [vmem:[%s4801_s1] sm:$0xff] }
   0xf   : > { %v273_v8 = vld [vmem:[%s3377_s19] sm:$0xff]  ;;  %v274_v9 = vld [vmem:[%s3377_s19 + $0x8] sm:$0xff]  ;;  %v275_v11 = vld [vmem:[%s3377_s19 + $0x10] sm:$0xff]  ;;  %s3961_s13 = scalar_lea.vmem %s4806_s6, %s3139_s11 }
  0x10   : > { %v321_v10 = vpack.c.bf16 %v274_v9, %v273_v8  ;;  %v276_v12 = vld [vmem:[%s3377_s19 + $0x18] sm:$0xff]  ;;  %v277_v14 = vld [vmem:[%s3377_s19 + $0x20] sm:$0xff]  ;;  %v278_v15 = vld [vmem:[%s3377_s19 + $0x28] sm:$0xff] }
  0x11   : > { %410 = vmatpush.bf16.msra.mxu0 %v2946_v1  ;;  %v322_v13 = vpack.c.bf16 %v276_v12, %v275_v11  ;;  %v323_v16 = vpack.c.bf16 %v278_v15, %v277_v14  ;;  %v279_v17 = vld [vmem:[%s3377_s19 + $0x30] sm:$0xff]  ;;  %v3390_v18 = vld [vmem:[%s3377_s19 + $0x38] sm:$0xff]  ;;  %v3394_v20 = vld [vmem:[%s3377_s19 + $0x40] sm:$0xff] }
  0x12   : > { %v324_v19 = vpack.c.bf16 %v3390_v18, %v279_v17  ;;  %v3397_v21 = vld [vmem:[%s3377_s19 + $0x48] sm:$0xff]  ;;  %v3402_v23 = vld [vmem:[%s3377_s19 + $0x50] sm:$0xff]  ;;  %v3405_v24 = vld [vmem:[%s3377_s19 + $0x58] sm:$0xff] }
  0x13   : > { %v325_v22 = vpack.c.bf16 %v3397_v21, %v3394_v20  ;;  %v326_v25 = vpack.c.bf16 %v3405_v24, %v3402_v23  ;;  %v3412_v26 = vld [vmem:[%s4802_s2] ss:$0 sm:$0xff]  ;;  %v3419_v33 = vld [vmem:[%s3377_s19 + $0x68] sm:$0xff]  ;;  %v3426_v39 = vld [vmem:[%s3377_s19 + $0x70] sm:$0xff]  ;;  %v3169_v55 = vpop.eup %3168 }
  0x14   : > { %v3416_v32 = vld [vmem:[%s3377_s19 + $0x60] sm:$0xff]  ;;  %v3429_v40 = vld [vmem:[%s3377_s19 + $0x78] sm:$0xff]  ;;  %v687_v56 = vmul.f32 128.0, %v3169_v55  ;;  %v3453_v59 = vld [vmem:[%s3377_s19 + $0x88] sm:$0xff]  ;;  %vm691_vm0 = vweird.f32 %v3169_v55 }
  0x15   : > { %411 = vmatpush.bf16.msra.mxu0 %v2945_v2  ;;  %v327_v34 = vpack.c.bf16 %v3419_v33, %v3416_v32  ;;  %v328_v42 = vpack.c.bf16 %v3429_v40, %v3426_v39  ;;  %v3450_v58 = vld [vmem:[%s3377_s19 + $0x80] sm:$0xff] }
  0x16   : > { %v688_v57 = vsub.f32 1.0, %v687_v56  ;;  %v329_v60 = vpack.c.bf16 %v3453_v59, %v3450_v58 }
  0x18   : > { %v689_v61 = vmul.f32 %v3169_v55, %v688_v57 }
  0x19   : > { %412 = vmatpush.bf16.msra.mxu0 %v2944_v3 }
  0x1a   : > { %v690_v63 = vadd.f32 %v3169_v55, %v689_v61 }
  0x1c   : > { %v3457_v0 = vsel %vm691_vm0, %v3169_v55, %v690_v63 }
  0x1d   : > { %413 = vmatpush.bf16.msra.mxu0 %v2943_v4 }
  0x21   : > { %414 = vmatpush.bf16.msra.mxu0 %v2942_v5 }
  0x25   : > { %415 = vmatpush.bf16.msra.mxu0 %v2941_v6 }
  0x29   : > { %416 = vmatpush.bf16.msra.mxu0 %v2940_v7 }
  0x2c   : > { %417 = vmatmul.bf16.vlgmr.msra.gmra.mxu0 %v321_v10  ;;  %v3469_v10 = vld [vmem:[%s3377_s19 + $0x90] sm:$0xff] }
  0x3c   : > { %422 = vmatmul.bf16.gmra.mxu0 %v322_v13 }
  0x4c   : > { %427 = vmatmul.bf16.gmra.mxu0 %v323_v16 }
  0x5c   : > { %432 = vmatmul.bf16.gmra.mxu0 %v324_v19 }
  0x6c   : > { %437 = vmatmul.bf16.gmra.mxu0 %v325_v22 }
  0x7c   : > { %442 = vmatmul.bf16.gmra.mxu0 %v326_v25 }
  0x8c   : > { %447 = vmatmul.bf16.gmra.mxu0 %v327_v34 }
  0x9c   : > { %452 = vmatmul.bf16.gmra.mxu0 %v328_v42 }
  0xa9   : > { %v418_v27 = vpop.f32.mrf.mxu0 }
  0xaa   : > { %v419_v28 = vadd.f32 %v418_v27, %v273_v8 }
  0xac   : > { %v542_v29 = vadd.f32 %v3412_v26, %v419_v28  ;;  %457 = vmatmul.bf16.gmra.mxu0 %v329_v60  ;;  %v3493_v28 = vld [vmem:[%s3377_s19 + $0xa0] sm:$0xff] }
  0xae   : > { %590 = vadd.xlane.f32.xlu0 %v542_v29 }
  0xb1   : > { %v420_v30 = vpop.f32.mrf.mxu0 }
  0xb2   : > { %v421_v31 = vadd.f32 %v420_v30, %v274_v9 }
  0xb4   : > { %v543_v35 = vadd.f32 %v3412_v26, %v421_v31 }
  0xb6   : > { %592 = vadd.xlane.f32.xlu0 %v543_v35 }
  0xb9   : > { %v423_v36 = vpop.f32.mrf.mxu0 }
  0xba   : > { %v424_v37 = vadd.f32 %v423_v36, %v275_v11  ;;  %v3472_v11 = vld [vmem:[%s3377_s19 + $0x98] sm:$0xff] }
  0xbb   : > { %v330_v13 = vpack.c.bf16 %v3472_v11, %v3469_v10 }
  0xbc   : > { %v544_v38 = vadd.f32 %v3412_v26, %v424_v37 }
  0xbd   : > { %462 = vmatmul.bf16.gmra.mxu0 %v330_v13 }
  0xbe   : > { %594 = vadd.xlane.f32.xlu1 %v544_v38 }
  0xc1   : > { %v425_v41 = vpop.f32.mrf.mxu0 }
  0xc2   : > { %v426_v43 = vadd.f32 %v425_v41, %v276_v12 }
  0xc4   : > { %v3434_v44 = vadd.f32 %v3412_v26, %v426_v43 }
  0xc6   : > { %596 = vadd.xlane.f32.xlu1 %v3434_v44 }
  0xc9   : > { %v428_v45 = vpop.f32.mrf.mxu0 }
  0xca   : > { %v429_v46 = vadd.f32 %v428_v45, %v277_v14 }
  0xcc   : > { %v3438_v47 = vadd.f32 %v3412_v26, %v429_v46 }
  0xce   : > { %598 = vadd.xlane.f32.xlu2 %v3438_v47 }
  0xd1   : > { %v430_v48 = vpop.f32.mrf.mxu0 }
  0xd2   : > { %v431_v49 = vadd.f32 %v430_v48, %v278_v15  ;;  %v3524_v48 = vld [vmem:[%s3377_s19 + $0xb0] sm:$0xff] }
  0xd4   : > { %v3442_v50 = vadd.f32 %v3412_v26, %v431_v49 }
  0xd6   : > { %600 = vadd.xlane.f32.xlu2 %v3442_v50 }
  0xd9   : > { %v433_v51 = vpop.f32.mrf.mxu0 }
  0xda   : > { %v434_v52 = vadd.f32 %v433_v51, %v279_v17 }
  0xdc   : > { %v3446_v53 = vadd.f32 %v3412_v26, %v434_v52 }
  0xde   : > { %602 = vadd.xlane.f32.xlu2 %v3446_v53 }
  0xe1   : > { %v435_v62 = vpop.f32.mrf.mxu0 }
  0xe2   : > { %v436_v7 = vadd.f32 %v435_v62, %v3390_v18 }
  0xe4   : > { %v3477_v14 = vadd.f32 %v3412_v26, %v436_v7 }
  0xe9   : > { %v438_v3 = vpop.f32.mrf.mxu0 }
  0xea   : > { %v439_v16 = vadd.f32 %v438_v3, %v3394_v20  ;;  %v3496_v20 = vld [vmem:[%s3377_s19 + $0xa8] sm:$0xff] }
  0xeb   : > { %v331_v34 = vpack.c.bf16 %v3496_v20, %v3493_v28 }
  0xec   : > { %v3487_v22 = vadd.f32 %v3412_v26, %v439_v16  ;;  %v2916_v16 = vld [vmem:[%s4805_s5 + $0x90] sm:$0xf] }
  0xed   : > { %467 = vmatmul.bf16.gmra.mxu0 %v331_v34 }
  0xf1   : > { %v440_v12 = vpop.f32.mrf.mxu0 }
  0xf2   : > { %v441_v30 = vadd.f32 %v440_v12, %v3397_v21  ;;  %v2995_v12 = vld [vmem:[%s4805_s5 + $0xb8] sm:$0xf0] }
  0xf4   : > { %v3508_v37 = vadd.f32 %v3412_v26, %v441_v30  ;;  %v2992_v30 = vld [vmem:[%s4805_s5 + $0xa0] sm:$0xf0] }
  0xf9   : > { %v443_v25 = vpop.f32.mrf.mxu0 }
  0xfa   : > { %v444_v21 = vadd.f32 %v443_v25, %v3402_v23  ;;  %v3527_v23 = vld [vmem:[%s3377_s19 + $0xb8] sm:$0xff] }
  0xfb   : > { %v332_v52 = vpack.c.bf16 %v3527_v23, %v3524_v48 }
  0xfd   : > { %472 = vmatmul.bf16.gmra.mxu0 %v332_v52  ;;  %v2985_v52 = vld [vmem:[%s4805_s5 + $0x68] sm:$0xf0] }
 0x121   : > { %v591_v1 = vpop.xlane.xlu0 %590 }
 0x122   : > { %v693_v2 = vmul.f32 %v3457_v0, %v591_v1 }
 0x124   : > { %v3460_v4 = vsub.f32 %v542_v29, %v693_v2 }
 0x126   : > { %v789_v5 = vmul.f32 %v3460_v4, %v3460_v4 }
 0x128   : > { %837 = vadd.xlane.f32.xlu0 %v789_v5  ;;  %v2928_v5 = vld [vmem:[%s4805_s5 + $0xa8] sm:$0xf] }
 0x129   : > { %v593_v6 = vpop.xlane.xlu0 %592 }
 0x12a   : > { %v694_v8 = vmul.f32 %v3457_v0, %v593_v6  ;;  %v2993_v6 = vld [vmem:[%s4805_s5 + $0xac] sm:$0xf] }
 0x12c   : > { %v3466_v9 = vsub.f32 %v543_v35, %v694_v8  ;;  %v2936_v8 = vld [vmem:[%s4805_s5 + $0xb0] sm:$0xf] }
 0x12e   : > { %v790_v15 = vmul.f32 %v3466_v9, %v3466_v9 }
 0x130   : > { %604 = vadd.xlane.f32.xlu0 %v3477_v14  ;;  %839 = vadd.xlane.f32.xlu1 %v790_v15  ;;  %v2937_v15 = vor.u32 %v2995_v12, %v2936_v8 }
 0x131   : > { %v595_v17 = vpop.xlane.xlu1 %594 }
 0x132   : > { %v695_v18 = vmul.f32 %v3457_v0, %v595_v17  ;;  %2367 = vmatpush.bf16.msra.mxu3 %v2937_v15  ;;  %v2991_v17 = vld [vmem:[%s4805_s5 + $0x98] sm:$0xf0] }
 0x133   : > { %v2917_v25 = vor.u32 %v2991_v17, %v2916_v16  ;;  %v2868_v16 = vld [vmem:[%s4805_s5 + $0x30] sm:$0xf]  ;;  %v2979_v17 = vld [vmem:[%s4805_s5 + $0x38] sm:$0xf0] }
 0x134   : > { %v3484_v19 = vsub.f32 %v544_v38, %v695_v18  ;;  %v445_v38 = vpop.f32.mrf.mxu0  ;;  %v2990_v18 = vld [vmem:[%s4805_s5 + $0x94] sm:$0xf] }
 0x135   : > { %v446_v46 = vadd.f32 %v445_v38, %v3405_v24  ;;  %v2988_v38 = vld [vmem:[%s4805_s5 + $0x80] sm:$0xf0] }
 0x136   : > { %v791_v27 = vmul.f32 %v3484_v19, %v3484_v19 }
 0x137   : > { %v3536_v55 = vadd.f32 %v3412_v26, %v446_v46  ;;  %v2989_v46 = vld [vmem:[%s4805_s5 + $0x88] sm:$0xf0] }
 0x138   : > { %606 = vadd.xlane.f32.xlu0 %v3487_v22  ;;  %841 = vadd.xlane.f32.xlu1 %v791_v27  ;;  %v2918_v27 = vld [vmem:[%s4805_s5 + $0x9c] sm:$0xf0] }
 0x139   : > { %v597_v29 = vpop.xlane.xlu1 %596 }
 0x13a   : > { %v696_v31 = vmul.f32 %v3457_v0, %v597_v29  ;;  %v2924_v29 = vld [vmem:[%s4805_s5 + $0x98] sm:$0xf] }
 0x13b   : > { %v2925_v34 = vor.u32 %v2992_v30, %v2924_v29  ;;  %v2870_v29 = vld [vmem:[%s4805_s5 + $0x3c] sm:$0xf0]  ;;  %v2876_v30 = vld [vmem:[%s4805_s5 + $0x38] sm:$0xf] }
 0x13c   : > { %v3503_v35 = vsub.f32 %v3434_v44, %v696_v31  ;;  %v3517_v44 = vadd.f32 %v3412_v26, %v444_v21  ;;  %v448_v51 = vpop.f32.mrf.mxu0  ;;  %v2921_v31 = vor.u32 %v2990_v18, %v2918_v27  ;;  %v2987_v21 = vld [vmem:[%s4805_s5 + $0x7c] sm:$0xf]  ;;  %v2978_v18 = vld [vmem:[%s4805_s5 + $0x34] sm:$0xf]  ;;  %v2869_v27 = vor.u32 %v2979_v17, %v2868_v16 }
 0x13d   : > { %v449_v56 = vadd.f32 %v448_v51, %v3416_v32  ;;  %2368 = vmatpush.bf16.msra.mxu3 %v2925_v34  ;;  %v2980_v34 = vld [vmem:[%s4805_s5 + $0x40] sm:$0xf0]  ;;  %v2974_v16 = vld [vmem:[%s4805_s5 + $0x10] sm:$0xf0] }
 0x13e   : > { %v792_v36 = vmul.f32 %v3503_v35, %v3503_v35 }
 0x140   : > { %843 = vadd.xlane.f32.xlu2 %v792_v36  ;;  %608 = vadd.xlane.f32.xlu1 %v3508_v37  ;;  %v2904_v36 = vld [vmem:[%s4805_s5 + $0x78] sm:$0xf] }
 0x141   : > { %v599_v41 = vpop.xlane.xlu2 %598 }
 0x142   : > { %v697_v42 = vmul.f32 %v3457_v0, %v599_v41  ;;  %v2905_v41 = vor.u32 %v2988_v38, %v2904_v36  ;;  %v3674_v36 = vld [vmem:[%s3377_s19 + $0xc0] sm:$0xff]  ;;  %v3677_v38 = vld [vmem:[%s3377_s19 + $0xc8] sm:$0xff] }
 0x144   : > { %v3514_v43 = vsub.f32 %v3438_v47, %v697_v42  ;;  %v450_v61 = vpop.f32.mrf.mxu0  ;;  %v2906_v42 = vld [vmem:[%s4805_s5 + $0x84] sm:$0xf0] }
 0x145   : > { %v451_v1 = vadd.f32 %v450_v61, %v3419_v33  ;;  %v2994_v33 = vld [vmem:[%s4805_s5 + $0xb0] sm:$0xf0] }
 0x146   : > { %v793_v45 = vmul.f32 %v3514_v43, %v3514_v43  ;;  %v2929_v7 = vor.u32 %v2994_v33, %v2928_v5  ;;  %v2986_v61 = vld [vmem:[%s4805_s5 + $0x70] sm:$0xf0]  ;;  %v2981_v5 = vld [vmem:[%s4805_s5 + $0x4c] sm:$0xf] }
 0x147   : > { %v3554_v32 = vadd.f32 %v3412_v26, %v451_v1 }
 0x148   : > { %845 = vadd.xlane.f32.xlu2 %v793_v45  ;;  %610 = vadd.xlane.f32.xlu1 %v3517_v44  ;;  %v2912_v45 = vld [vmem:[%s4805_s5 + $0x80] sm:$0xf] }
 0x149   : > { %v601_v49 = vpop.xlane.xlu2 %600  ;;  %2109 = vmatpush.bf16.msra.mxu1 %v2929_v7  ;;  %v2913_v51 = vor.u32 %v2989_v46, %v2912_v45  ;;  %v2888_v7 = vld [vmem:[%s4805_s5 + $0x50] sm:$0xf]  ;;  %v2976_v45 = vld [vmem:[%s4805_s5 + $0x20] sm:$0xf0]  ;;  %v2975_v46 = vld [vmem:[%s4805_s5 + $0x1c] sm:$0xf] }
 0x14a   : > { %v698_v47 = vmul.f32 %v3457_v0, %v601_v49  ;;  %v2909_v49 = vor.u32 %v2987_v21, %v2906_v42  ;;  %v2877_v21 = vor.u32 %v2980_v34, %v2876_v30  ;;  %v2856_v42 = vld [vmem:[%s4805_s5 + $0x18] sm:$0xf] }
 0x14b   : > { %2369 = vmatpush.bf16.msra.mxu3 %v2913_v51  ;;  %v2857_v51 = vor.u32 %v2976_v45, %v2856_v42 }
 0x14c   : > { %v3533_v54 = vsub.f32 %v3442_v50, %v698_v47  ;;  %v3547_v50 = vadd.f32 %v3412_v26, %v449_v56  ;;  %v453_v2 = vpop.f32.mrf.mxu0  ;;  %v2892_v47 = vld [vmem:[%s4805_s5 + $0x60] sm:$0xf] }
 0x14d   : > { %2110 = vmatpush.bf16.msra.mxu1 %v2917_v25  ;;  %v2893_v56 = vor.u32 %v2985_v52, %v2892_v47  ;;  %v2858_v47 = vld [vmem:[%s4805_s5 + $0x24] sm:$0xf0]  ;;  %v2864_v52 = vld [vmem:[%s4805_s5 + $0x20] sm:$0xf] }
 0x14e   : > { %v794_v24 = vmul.f32 %v3533_v54, %v3533_v54 }
 0x150   : > { %612 = vadd.xlane.f32.xlu2 %v3536_v55  ;;  %847 = vadd.xlane.f32.xlu0 %v794_v24  ;;  %v2984_v24 = vld [vmem:[%s4805_s5 + $0x64] sm:$0xf] }
 0x151   : > { %v603_v57 = vpop.xlane.xlu2 %602  ;;  %2111 = vmatpush.bf16.msra.mxu1 %v2905_v41  ;;  %v333_v41 = vpack.c.bf16 %v3677_v38, %v3674_v36 }
 0x152   : > { %v699_v60 = vmul.f32 %v3457_v0, %v603_v57  ;;  %v2894_v57 = vld [vmem:[%s4805_s5 + $0x6c] sm:$0xf0] }
 0x153   : > { %477 = vmatmul.bf16.gmra.mxu0 %v333_v41 }
 0x154   : > { %v3544_v62 = vsub.f32 %v3446_v53, %v699_v60  ;;  %v454_v53 = vadd.f32 %v453_v2, %v3426_v39  ;;  %v2930_v39 = vld [vmem:[%s4805_s5 + $0xb4] sm:$0xf0]  ;;  %v2900_v60 = vld [vmem:[%s4805_s5 + $0x68] sm:$0xf] }
 0x155   : > { %v2933_v13 = vor.u32 %v2993_v6, %v2930_v39  ;;  %v2901_v1 = vor.u32 %v2986_v61, %v2900_v60  ;;  %2112 = vmatpush.bf16.msra.mxu1 %v2893_v56  ;;  %v2880_v2 = vld [vmem:[%s4805_s5 + $0x48] sm:$0xf]  ;;  %v2882_v6 = vld [vmem:[%s4805_s5 + $0x54] sm:$0xf0]  ;;  %v2983_v39 = vld [vmem:[%s4805_s5 + $0x58] sm:$0xf0]  ;;  %v2861_v60 = vor.u32 %v2975_v46, %v2858_v47 }
 0x156   : > { %v795_v63 = vmul.f32 %v3544_v62, %v3544_v62  ;;  %v3559_v3 = vadd.f32 %v3412_v26, %v454_v53  ;;  %v2982_v53 = vld [vmem:[%s4805_s5 + $0x50] sm:$0xf0]  ;;  %v2885_v12 = vor.u32 %v2981_v5, %v2882_v6  ;;  %v2972_v5 = vld [vmem:[%s4805_s5 + $0x4] sm:$0xf] }
 0x157   : > { %2238 = vmatpush.bf16.msra.mxu2 %v2933_v13  ;;  %2370 = vmatpush.bf16.msra.mxu3 %v2901_v1  ;;  %v2881_v33 = vor.u32 %v2982_v53, %v2880_v2  ;;  %v2889_v13 = vor.u32 %v2983_v39, %v2888_v7  ;;  %v2844_v2 = vld [vmem:[%s4805_s5] sm:$0xf]  ;;  %v2973_v53 = vld [vmem:[%s4805_s5 + $0x8] sm:$0xf0] }
 0x158   : > { %614 = vadd.xlane.f32.xlu2 %v3547_v50  ;;  %849 = vadd.xlane.f32.xlu0 %v795_v63  ;;  %v2897_v63 = vor.u32 %v2984_v24, %v2894_v57  ;;  %v2977_v24 = vld [vmem:[%s4805_s5 + $0x28] sm:$0xf0]  ;;  %v2845_v39 = vor.u32 %v2973_v53, %v2844_v2 }
 0x159   : > { %2113 = vmatpush.bf16.msra.mxu1 %v2881_v33  ;;  %v2865_v61 = vor.u32 %v2977_v24, %v2864_v52 }
 0x15b   : > { %2239 = vmatpush.bf16.msra.mxu2 %v2921_v31  ;;  %2371 = vmatpush.bf16.msra.mxu3 %v2889_v13  ;;  %v2873_v31 = vor.u32 %v2978_v18, %v2870_v29 }
 0x15d   : > { %2114 = vmatpush.bf16.msra.mxu1 %v2869_v27 }
 0x15f   : > { %2240 = vmatpush.bf16.msra.mxu2 %v2909_v49  ;;  %v455_v49 = vpop.f32.mrf.mxu0  ;;  %2372 = vmatpush.bf16.msra.mxu3 %v2877_v21 }
 0x160   : > { %616 = vadd.xlane.f32.xlu0 %v3554_v32 }
 0x161   : > { %2115 = vmatpush.bf16.msra.mxu1 %v2857_v51 }
 0x163   : > { %2241 = vmatpush.bf16.msra.mxu2 %v2897_v63  ;;  %2373 = vmatpush.bf16.msra.mxu3 %v2865_v61 }
 0x165   : > { %2116 = vmatpush.bf16.msra.mxu1 %v2845_v39 }
 0x167   : > { %2242 = vmatpush.bf16.msra.mxu2 %v2885_v12  ;;  %v2852_v12 = vld [vmem:[%s4805_s5 + $0x8] sm:$0xf]  ;;  %v458_v41 = vpop.f32.mrf.mxu0 }
 0x168   : > { %618 = vadd.xlane.f32.xlu0 %v3559_v3  ;;  %v2853_v17 = vor.u32 %v2974_v16, %v2852_v12 }
 0x16a   : > { %2374 = vmatpush.bf16.msra.mxu3 %v2853_v17  ;;  %v3770_v17 = vld [vmem:[%s4804_s4] ss:$0 sm:$0xff] }
 0x16b   : > { %2243 = vmatpush.bf16.msra.mxu2 %v2873_v31 }
 0x16f   : > { %2244 = vmatpush.bf16.msra.mxu2 %v2861_v60 }
 0x19b   : > { %v838_v8 = vpop.xlane.xlu0 %837 }
 0x19c   : > { %v933_v15 = vmul.f32 %v838_v8, %v3457_v0  ;;  %v2846_v8 = vld [vmem:[%s4805_s5 + $0xc] sm:$0xf0] }
 0x19e   : > { %v3662_v25 = vadd.f32 1e-05, %v933_v15  ;;  %v2849_v15 = vor.u32 %v2972_v5, %v2846_v8  ;;  %v460_v8 = vpop.f32.mrf.mxu0 }
 0x1a0   : > { %3170 = vrsqrt.f32 %v3662_v25  ;;  %2245 = vmatpush.bf16.msra.mxu2 %v2849_v15  ;;  %vm1035_vm2 = vweird.f32 %v3662_v25  ;;  %v3762_v15 = vld [vmem:[%s3377_s19 + $0xd8] sm:$0xff] }
 0x1a3   : > { %v840_v56 = vpop.xlane.xlu1 %839  ;;  %v605_v57 = vpop.xlane.xlu0 %604 }
 0x1a4   : > { %v934_v63 = vmul.f32 %v840_v56, %v3457_v0  ;;  %v700_v1 = vmul.f32 %v3457_v0, %v605_v57 }
 0x1a6   : > { %v3171_v33 = vpop.eup %3170  ;;  %v982_v6 = vadd.f32 1e-05, %v934_v63  ;;  %v3712_v7 = vsub.f32 %v3477_v14, %v700_v1 }
 0x1a7   : > { %v1030_v13 = vmul.f32 %v3171_v33, %v3662_v25  ;;  %vm1036_vm1 = vweird.f32 %v3171_v33  ;;  %v3743_v25 = vld [vmem:[%s4803_s3] ss:$0 sm:$0xff] }
 0x1a8   : > { %3172 = vrsqrt.f32 %v982_v6  ;;  %v796_v14 = vmul.f32 %v3712_v7, %v3712_v7  ;;  %vm1037_vm3 = vmor %vm1035_vm2, %vm1036_vm1  ;;  %vm1045_vm5 = vweird.f32 %v982_v6 }
 0x1a9   : > { %v1031_v18 = vmul.f32 %v3171_v33, %v1030_v13 }
 0x1aa   : > { %851 = vadd.xlane.f32.xlu1 %v796_v14 }
 0x1ab   : > { %v1032_v27 = vmul.f32 0.5, %v1031_v18  ;;  %v842_v29 = vpop.xlane.xlu1 %841  ;;  %v607_v30 = vpop.xlane.xlu0 %606 }
 0x1ac   : > { %v935_v31 = vmul.f32 %v842_v29, %v3457_v0  ;;  %v701_v34 = vmul.f32 %v3457_v0, %v607_v30 }
 0x1ad   : > { %v1033_v21 = vsub.f32 1.5, %v1032_v27 }
 0x1ae   : > { %v3173_v42 = vpop.eup %3172  ;;  %v3728_v45 = vadd.f32 1e-05, %v935_v31  ;;  %v3731_v46 = vsub.f32 %v3487_v22, %v701_v34  ;;  %v456_v22 = vadd.f32 %v455_v49, %v3429_v40 }
 0x1af   : > { %v1034_v51 = vmul.f32 %v3171_v33, %v1033_v21  ;;  %v1040_v47 = vmul.f32 %v3173_v42, %v982_v6  ;;  %vm1046_vm4 = vweird.f32 %v3173_v42  ;;  %v459_v6 = vadd.f32 %v458_v41, %v3450_v58 }
 0x1b0   : > { %3174 = vrsqrt.f32 %v3728_v45  ;;  %v797_v52 = vmul.f32 %v3731_v46, %v3731_v46  ;;  %vm1047_vm6 = vmor %vm1045_vm5, %vm1046_vm4  ;;  %v3756_v13 = vadd.f32 %v3412_v26, %v456_v22  ;;  %vm1055_vm8 = vweird.f32 %v3728_v45 }
 0x1b1   : > { %v1041_v24 = vmul.f32 %v3173_v42, %v1040_v47  ;;  %v1038_v56 = vsel %vm1037_vm3, %v3171_v33, %v1034_v51 }
 0x1b2   : > { %853 = vadd.xlane.f32.xlu1 %v797_v52  ;;  %v1509_v5 = vmul.f32 %v1038_v56, %v3460_v4  ;;  %v3759_v4 = vld [vmem:[%s3377_s19 + $0xd0] sm:$0xff] }
 0x1b3   : > { %v1042_v57 = vmul.f32 0.5, %v1041_v24  ;;  %v844_v60 = vpop.xlane.xlu2 %843  ;;  %v609_v61 = vpop.xlane.xlu1 %608  ;;  %v334_v14 = vpack.c.bf16 %v3762_v15, %v3759_v4 }
 0x1b4   : > { %v936_v63 = vmul.f32 %v844_v60, %v3457_v0  ;;  %v702_v1 = vmul.f32 %v3457_v0, %v609_v61  ;;  %v1561_v18 = vmul.f32 %v3743_v25, %v1509_v5  ;;  %v463_v60 = vpop.f32.mrf.mxu0 }
 0x1b5   : > { %v1043_v2 = vsub.f32 1.5, %v1042_v57  ;;  %482 = vmatmul.bf16.gmra.mxu0 %v334_v14 }
 0x1b6   : > { %v3175_v53 = vpop.eup %3174  ;;  %v3746_v33 = vadd.f32 1e-05, %v936_v63  ;;  %v3749_v40 = vsub.f32 %v3508_v37, %v702_v1 }
 0x1b7   : > { %v1044_v49 = vmul.f32 %v3173_v42, %v1043_v2  ;;  %v1050_v39 = vmul.f32 %v3175_v53, %v3728_v45  ;;  %vm1056_vm7 = vweird.f32 %v3175_v53 }
 0x1b8   : > { %3176 = vrsqrt.f32 %v3746_v33  ;;  %v798_v12 = vmul.f32 %v3749_v40, %v3749_v40  ;;  %vm1057_vm9 = vmor %vm1055_vm8, %vm1056_vm7  ;;  %vm1065_vm11 = vweird.f32 %v3746_v33 }
 0x1b9   : > { %v1048_v37 = vsel %vm1047_vm6, %v3173_v42, %v1044_v49  ;;  %v1051_v16 = vmul.f32 %v3175_v53, %v1050_v39  ;;  %v3779_v42 = vadd.f32 %v3412_v26, %v459_v6  ;;  %v461_v49 = vadd.f32 %v460_v8, %v3453_v59 }
 0x1ba   : > { %v1510_v27 = vmul.f32 %v1048_v37, %v3466_v9  ;;  %855 = vadd.xlane.f32.xlu2 %v798_v12  ;;  %620 = vadd.xlane.f32.xlu1 %v3756_v13  ;;  %v1613_v9 = vadd.f32 %v3770_v17, %v1561_v18  ;;  %v3802_v18 = vld [vmem:[%s3377_s19 + $0xe0] sm:$0xff] }
 0x1bb   : > { %v1052_v29 = vmul.f32 0.5, %v1051_v16  ;;  %v846_v30 = vpop.xlane.xlu2 %845  ;;  %v611_v31 = vpop.xlane.xlu1 %610 }
 0x1bc   : > { %v1562_v58 = vmul.f32 %v3743_v25, %v1510_v27  ;;  %v937_v34 = vmul.f32 %v846_v30, %v3457_v0  ;;  %v703_v21 = vmul.f32 %v3457_v0, %v611_v31 }
 0x1bd   : > { %v1053_v41 = vsub.f32 1.5, %v1052_v29 }
 0x1be   : > { %v3177_v51 = vpop.eup %3176  ;;  %v1614_v47 = vadd.f32 %v3770_v17, %v1562_v58  ;;  %v3783_v52 = vadd.f32 1e-05, %v937_v34  ;;  %v3786_v24 = vsub.f32 %v3517_v44, %v703_v21  ;;  %v465_v58 = vpop.f32.mrf.mxu0  ;;  %v464_v21 = vadd.f32 %v463_v60, %v3469_v10 }
 0x1bf   : > { %v1054_v56 = vmul.f32 %v3175_v53, %v1053_v41  ;;  %v1060_v57 = vmul.f32 %v3177_v51, %v3746_v33  ;;  %vm1066_vm10 = vweird.f32 %v3177_v51 }
 0x1c0   : > { %v2999_v61 = vpack.c.bf16 %v1614_v47, %v1613_v9  ;;  %3178 = vrsqrt.f32 %v3783_v52  ;;  %v799_v22 = vmul.f32 %v3786_v24, %v3786_v24  ;;  %vm1067_vm12 = vmor %vm1065_vm11, %vm1066_vm10  ;;  %v3830_v60 = vadd.f32 %v3412_v26, %v464_v21 }
 0x1c1   : > { %v1061_v63 = vmul.f32 %v3177_v51, %v1060_v57  ;;  %v1058_v44 = vsel %vm1057_vm9, %v3175_v53, %v1054_v56  ;;  %v3805_v53 = vld [vmem:[%s3377_s19 + $0xe8] sm:$0xff]  ;;  %vm1075_vm14 = vweird.f32 %v3783_v52 }
 0x1c2   : > { %3000 = vst [vmem:[#allocation2 + $0xb0] sm:$0xff] %v2999_v61   ;;  %857 = vadd.xlane.f32.xlu2 %v799_v22  ;;  %622 = vadd.xlane.f32.xlu1 %v3779_v42  ;;  %v1511_v16 = vmul.f32 %v1058_v44, %v3484_v19  ;;  %v3812_v19 = vadd.f32 %v3412_v26, %v461_v49 }
 0x1c3   : > { %v1062_v1 = vmul.f32 0.5, %v1061_v63  ;;  %v613_v2 = vpop.xlane.xlu2 %612  ;;  %v848_v5 = vpop.xlane.xlu0 %847 }
 0x1c4   : > { %v704_v39 = vmul.f32 %v3457_v0, %v613_v2  ;;  %v938_v12 = vmul.f32 %v848_v5, %v3457_v0  ;;  %v1563_v34 = vmul.f32 %v3743_v25, %v1511_v16 }
 0x1c5   : > { %v1063_v37 = vsub.f32 1.5, %v1062_v1 }
 0x1c6   : > { %v3179_v45 = vpop.eup %3178  ;;  %v3799_v6 = vsub.f32 %v3536_v55, %v704_v39  ;;  %v986_v14 = vadd.f32 1e-05, %v938_v12  ;;  %v335_v55 = vpack.c.bf16 %v3805_v53, %v3802_v18 }
 0x1c7   : > { %v1064_v27 = vmul.f32 %v3177_v51, %v1063_v37  ;;  %v1070_v59 = vmul.f32 %v3179_v45, %v3783_v52  ;;  %vm1076_vm13 = vweird.f32 %v3179_v45  ;;  %v468_v37 = vpop.f32.mrf.mxu0 }
 0x1c8   : > { %3180 = vrsqrt.f32 %v986_v14  ;;  %v800_v8 = vmul.f32 %v3799_v6, %v3799_v6  ;;  %487 = vmatmul.bf16.gmra.mxu0 %v335_v55  ;;  %vm1077_vm15 = vmor %vm1075_vm14, %vm1076_vm13  ;;  %vm1085_vm1 = vweird.f32 %v986_v14 }
 0x1c9   : > { %v1068_v29 = vsel %vm1067_vm12, %v3177_v51, %v1064_v27  ;;  %v1071_v30 = vmul.f32 %v3179_v45, %v1070_v59  ;;  %v2948_v31 = vld [vmem:[#allocation2 + $0xb0] sm:$0xff] }
 0x1ca   : > { %v1512_v33 = vmul.f32 %v1068_v29, %v3503_v35  ;;  %859 = vadd.xlane.f32.xlu0 %v800_v8  ;;  %624 = vadd.xlane.f32.xlu2 %v3812_v19  ;;  %v1615_v35 = vadd.f32 %v3770_v17, %v1563_v34  ;;  %v3839_v59 = vld [vmem:[%s3377_s19 + $0xf0] sm:$0xff]  ;;  %v3842_v8 = vld [vmem:[%s3377_s19 + $0xf8] sm:$0xff] }
 0x1cb   : > { %v1072_v41 = vmul.f32 0.5, %v1071_v30  ;;  %v615_v9 = vpop.xlane.xlu2 %614  ;;  %v3820_v47 = vpop.xlane.xlu0 %849  ;;  %2117 = vmatmul.bf16.vlgmr.msra.gmra.mxu1 %v2948_v31  ;;  %2246 = vmatmul.bf16.vlgmr.msra.gmra.mxu2 %v2948_v31  ;;  %v336_v30 = vpack.c.bf16 %v3842_v8, %v3839_v59 }
 0x1cc   : > { %v1564_v51 = vmul.f32 %v3743_v25, %v1512_v33  ;;  %v705_v56 = vmul.f32 %v3457_v0, %v615_v9  ;;  %2375 = vmatmul.bf16.vlgmr.msra.gmra.mxu3 %v2948_v31 }
 0x1cd   : > { %v1073_v57 = vsub.f32 1.5, %v1072_v41 }
 0x1ce   : > { %v3181_v61 = vpop.eup %3180  ;;  %v1616_v22 = vadd.f32 %v3770_v17, %v1564_v51  ;;  %v3827_v10 = vsub.f32 %v3547_v50, %v705_v56  ;;  %v466_v50 = vadd.f32 %v465_v58, %v3472_v11 }
 0x1cf   : > { %v1074_v63 = vmul.f32 %v3179_v45, %v1073_v57  ;;  %v1080_v44 = vmul.f32 %v3181_v61, %v986_v14  ;;  %vm1086_vm0 = vweird.f32 %v3181_v61  ;;  %v470_v41 = vpop.f32.mrf.mxu0 }
 0x1d0   : > { %v3004_v1 = vpack.c.bf16 %v1616_v22, %v1615_v35  ;;  %v801_v2 = vmul.f32 %v3827_v10, %v3827_v10  ;;  %v3849_v29 = vadd.f32 %v3412_v26, %v466_v50  ;;  %vm1087_vm2 = vmor %vm1085_vm1, %vm1086_vm0 }
 0x1d1   : > { %v1081_v5 = vmul.f32 %v3181_v61, %v1080_v44  ;;  %v1078_v49 = vsel %vm1077_vm15, %v3179_v45, %v1074_v63 }
 0x1d2   : > { %3116 = vst [vmem:[#allocation2] sm:$0xff] %v3004_v1   ;;  %861 = vadd.xlane.f32.xlu0 %v801_v2  ;;  %626 = vadd.xlane.f32.xlu2 %v3830_v60  ;;  %v1513_v52 = vmul.f32 %v1078_v49, %v3514_v43 }
 0x1d3   : > { %v1082_v39 = vmul.f32 0.5, %v1081_v5  ;;  %v617_v12 = vpop.xlane.xlu0 %616 }
 0x1d4   : > { %v706_v16 = vmul.f32 %v3457_v0, %v617_v12  ;;  %v1565_v34 = vmul.f32 %v3743_v25, %v1513_v52 }
 0x1d5   : > { %v1083_v27 = vsub.f32 1.5, %v1082_v39 }
 0x1d6   : > { %v3846_v55 = vsub.f32 %v3554_v32, %v706_v16  ;;  %v469_v32 = vadd.f32 %v468_v37, %v3493_v28  ;;  %v1617_v9 = vadd.f32 %v3770_v17, %v1565_v34 }
 0x1d7   : > { %v1084_v11 = vmul.f32 %v3181_v61, %v1083_v27  ;;  %v473_v22 = vpop.f32.mrf.mxu0 }
 0x1d8   : > { %v802_v45 = vmul.f32 %v3846_v55, %v3846_v55  ;;  %492 = vmatmul.bf16.gmra.mxu0 %v336_v30  ;;  %v3867_v56 = vadd.f32 %v3412_v26, %v469_v32  ;;  %v3890_v30 = vld [vmem:[%s3377_s19 + $0x108] sm:$0xff] }
 0x1d9   : > { %v1088_v31 = vsel %vm1087_vm2, %v3181_v61, %v1084_v11  ;;  %v2949_v58 = vld [vmem:[#allocation2] sm:$0xff]  ;;  %v471_v61 = vadd.f32 %v470_v41, %v3496_v20  ;;  %v939_v20 = vmul.f32 %v3820_v47, %v3457_v0 }
 0x1da   : > { %v1514_v43 = vmul.f32 %v1088_v31, %v3533_v54  ;;  %628 = vadd.xlane.f32.xlu0 %v3849_v29  ;;  %863 = vadd.xlane.f32.xlu1 %v802_v45  ;;  %v3887_v45 = vld [vmem:[%s3377_s19 + $0x100] sm:$0xff] }
 0x1db   : > { %v619_v33 = vpop.xlane.xlu0 %618  ;;  %2122 = vmatmul.bf16.gmra.mxu1 %v2949_v58  ;;  %2251 = vmatmul.bf16.gmra.mxu2 %v2949_v58  ;;  %v3874_v35 = vadd.f32 %v3412_v26, %v471_v61  ;;  %v987_v1 = vadd.f32 1e-05, %v939_v20 }
 0x1dc   : > { %v1566_v14 = vmul.f32 %v3743_v25, %v1514_v43  ;;  %v707_v21 = vmul.f32 %v3457_v0, %v619_v33  ;;  %2380 = vmatmul.bf16.gmra.mxu3 %v2949_v58  ;;  %v337_v58 = vpack.c.bf16 %v3890_v30, %v3887_v45 }
 0x1dd   : > { %3182 = vrsqrt.f32 %v987_v1  ;;  %vm1095_vm4 = vweird.f32 %v987_v1 }
 0x1de   : > { %v1618_v51 = vadd.f32 %v3770_v17, %v1566_v14  ;;  %v3864_v54 = vsub.f32 %v3559_v3, %v707_v21  ;;  %v474_v3 = vadd.f32 %v473_v22, %v3524_v48 }
 0x1df   : > { %v475_v34 = vpop.f32.mrf.mxu0 }
 0x1e0   : > { %v3009_v28 = vpack.c.bf16 %v1618_v51, %v1617_v9  ;;  %v803_v57 = vmul.f32 %v3864_v54, %v3864_v54  ;;  %v3879_v44 = vadd.f32 %v3412_v26, %v474_v3 }
 0x1e2   : > { %3117 = vst [vmem:[#allocation2 + $0x10] sm:$0xff] %v3009_v28   ;;  %630 = vadd.xlane.f32.xlu0 %v3867_v56  ;;  %865 = vadd.xlane.f32.xlu1 %v803_v57 }
 0x1e3   : > { %v3183_v2 = vpop.eup %3182 }
 0x1e4   : > { %v1090_v5 = vmul.f32 %v3183_v2, %v987_v1  ;;  %vm1096_vm3 = vweird.f32 %v3183_v2 }
 0x1e5   : > { %vm1097_vm5 = vmor %vm1095_vm4, %vm1096_vm3 }
 0x1e6   : > { %v1091_v50 = vmul.f32 %v3183_v2, %v1090_v5 }
 0x1e8   : > { %v1092_v12 = vmul.f32 0.5, %v1091_v50  ;;  %497 = vmatmul.bf16.gmra.mxu0 %v337_v58 }
 0x1e9   : > { %v2950_v63 = vld [vmem:[#allocation2 + $0x10] sm:$0xff] }
 0x1ea   : > { %632 = vadd.xlane.f32.xlu1 %v3874_v35  ;;  %v1093_v26 = vsub.f32 1.5, %v1092_v12 }
 0x1eb   : > { %2127 = vmatmul.bf16.gmra.mxu1 %v2950_v63  ;;  %2256 = vmatmul.bf16.gmra.mxu2 %v2950_v63 }
 0x1ec   : > { %2385 = vmatmul.bf16.gmra.mxu3 %v2950_v63  ;;  %v1094_v47 = vmul.f32 %v3183_v2, %v1093_v26  ;;  %v478_v26 = vpop.f32.mrf.mxu0 }
 0x1ee   : > { %v1098_v43 = vsel %vm1097_vm5, %v3183_v2, %v1094_v47 }
 0x1ef   : > { %v1515_v28 = vmul.f32 %v1098_v43, %v3544_v62 }
 0x1f1   : > { %v1567_v2 = vmul.f32 %v3743_v25, %v1515_v28 }
 0x1f2   : > { %634 = vadd.xlane.f32.xlu1 %v3879_v44 }
 0x21d   : > { %v852_v49 = vpop.xlane.xlu1 %851 }
 0x21e   : > { %v940_v48 = vmul.f32 %v852_v49, %v3457_v0 }
 0x220   : > { %v988_v39 = vadd.f32 1e-05, %v940_v48 }
 0x222   : > { %3184 = vrsqrt.f32 %v988_v39  ;;  %vm1105_vm7 = vweird.f32 %v988_v39 }
 0x225   : > { %v854_v37 = vpop.xlane.xlu1 %853 }
 0x226   : > { %v941_v16 = vmul.f32 %v854_v37, %v3457_v0 }
 0x228   : > { %v3185_v27 = vpop.eup %3184  ;;  %v989_v52 = vadd.f32 1e-05, %v941_v16  ;;  %v1619_v16 = vadd.f32 %v3770_v17, %v1567_v2  ;;  %v3946_v2 = vld [vmem:[%s3377_s19 + $0x118] sm:$0xff] }
 0x229   : > { %v1100_v11 = vmul.f32 %v3185_v27, %v988_v39  ;;  %vm1106_vm6 = vweird.f32 %v3185_v27 }
 0x22a   : > { %3186 = vrsqrt.f32 %v989_v52  ;;  %vm1107_vm8 = vmor %vm1105_vm7, %vm1106_vm6  ;;  %vm1115_vm10 = vweird.f32 %v989_v52 }
 0x22b   : > { %v1101_v31 = vmul.f32 %v3185_v27, %v1100_v11 }
 0x22d   : > { %v1102_v32 = vmul.f32 0.5, %v1101_v31  ;;  %v856_v33 = vpop.xlane.xlu2 %855  ;;  %v621_v14 = vpop.xlane.xlu1 %620 }
 0x22e   : > { %v942_v21 = vmul.f32 %v856_v33, %v3457_v0  ;;  %v708_v41 = vmul.f32 %v3457_v0, %v621_v14 }
 0x22f   : > { %v1103_v9 = vsub.f32 1.5, %v1102_v32 }
 0x230   : > { %v3187_v51 = vpop.eup %3186  ;;  %v990_v57 = vadd.f32 1e-05, %v942_v21  ;;  %v3898_v61 = vsub.f32 %v3756_v13, %v708_v41 }
 0x231   : > { %v1104_v22 = vmul.f32 %v3185_v27, %v1103_v9  ;;  %v1110_v63 = vmul.f32 %v3187_v51, %v989_v52  ;;  %vm1116_vm9 = vweird.f32 %v3187_v51 }
 0x232   : > { %3188 = vrsqrt.f32 %v990_v57  ;;  %v804_v3 = vmul.f32 %v3898_v61, %v3898_v61  ;;  %vm1117_vm11 = vmor %vm1115_vm10, %vm1116_vm9  ;;  %vm1125_vm13 = vweird.f32 %v990_v57 }
 0x233   : > { %v1108_v20 = vsel %vm1107_vm8, %v3185_v27, %v1104_v22  ;;  %v1111_v1 = vmul.f32 %v3187_v51, %v1110_v63 }
 0x234   : > { %v1516_v5 = vmul.f32 %v1108_v20, %v3712_v7  ;;  %867 = vadd.xlane.f32.xlu2 %v804_v3 }
 0x235   : > { %v1112_v62 = vmul.f32 0.5, %v1111_v1  ;;  %v858_v50 = vpop.xlane.xlu2 %857  ;;  %v623_v49 = vpop.xlane.xlu1 %622 }
 0x236   : > { %v1568_v13 = vmul.f32 %v3743_v25, %v1516_v5  ;;  %v943_v48 = vmul.f32 %v858_v50, %v3457_v0  ;;  %v709_v39 = vmul.f32 %v3457_v0, %v623_v49  ;;  %v479_v50 = vadd.f32 %v478_v26, %v3674_v36 }
 0x237   : > { %v1113_v12 = vsub.f32 1.5, %v1112_v62 }
 0x238   : > { %v3189_v37 = vpop.eup %3188  ;;  %v1620_v27 = vadd.f32 %v3770_v17, %v1568_v13  ;;  %v3909_v47 = vadd.f32 1e-05, %v943_v48  ;;  %v3912_v7 = vsub.f32 %v3779_v42, %v709_v39  ;;  %v476_v42 = vadd.f32 %v475_v34, %v3527_v23  ;;  %v480_v34 = vpop.f32.mrf.mxu0 }
 0x239   : > { %v1114_v11 = vmul.f32 %v3187_v51, %v1113_v12  ;;  %v1120_v31 = vmul.f32 %v3189_v37, %v990_v57  ;;  %vm1126_vm12 = vweird.f32 %v3189_v37  ;;  %v3943_v57 = vld [vmem:[%s3377_s19 + $0x110] sm:$0xff] }
 0x23a   : > { %v3014_v58 = vpack.c.bf16 %v1620_v27, %v1619_v16  ;;  %3190 = vrsqrt.f32 %v3909_v47  ;;  %v805_v43 = vmul.f32 %v3912_v7, %v3912_v7  ;;  %vm1127_vm14 = vmor %vm1125_vm13, %vm1126_vm12  ;;  %v338_v13 = vpack.c.bf16 %v3946_v2, %v3943_v57 }
 0x23b   : > { %v1121_v32 = vmul.f32 %v3189_v37, %v1120_v31  ;;  %v1118_v33 = vsel %vm1117_vm11, %v3187_v51, %v1114_v11  ;;  %vm1135_vm0 = vweird.f32 %v3909_v47 }
 0x23c   : > { %3118 = vst [vmem:[#allocation2 + $0x48] sm:$0xff] %v3014_v58   ;;  %869 = vadd.xlane.f32.xlu2 %v805_v43  ;;  %v1517_v63 = vmul.f32 %v1118_v33, %v3731_v46  ;;  %v3936_v46 = vld [vmem:[%s4802_s2] ss:$0 sm:$0xff]  ;;  %502 = vmatmul.bf16.gmra.mxu0 %v338_v13 }
 0x23d   : > { %v1122_v14 = vmul.f32 0.5, %v1121_v32  ;;  %v625_v21 = vpop.xlane.xlu2 %624  ;;  %v860_v41 = vpop.xlane.xlu0 %859  ;;  %v3964_v11 = vadd.f32 %v3936_v46, %v479_v50 }
 0x23e   : > { %v710_v9 = vmul.f32 %v3457_v0, %v625_v21  ;;  %v944_v28 = vmul.f32 %v860_v41, %v3457_v0  ;;  %v1569_v48 = vmul.f32 %v3743_v25, %v1517_v63 }
 0x23f   : > { %v1123_v22 = vsub.f32 1.5, %v1122_v14 }
 0x240   : > { %v3920_v52 = vpop.eup %3190  ;;  %v3924_v51 = vsub.f32 %v3812_v19, %v710_v9  ;;  %v3926_v3 = vadd.f32 1e-05, %v944_v28  ;;  %v3939_v19 = vadd.f32 %v3936_v46, %v476_v42  ;;  %v1621_v58 = vadd.f32 %v3770_v17, %v1569_v48  ;;  %v483_v42 = vpop.f32.mrf.mxu0 }
 0x241   : > { %v1124_v20 = vmul.f32 %v3189_v37, %v1123_v22  ;;  %v1130_v23 = vmul.f32 %v3920_v52, %v3909_v47  ;;  %vm1136_vm15 = vweird.f32 %v3920_v52  ;;  %v481_v47 = vadd.f32 %v480_v34, %v3677_v38 }
 0x242   : > { %3192 = vrsqrt.f32 %v3926_v3  ;;  %v806_v1 = vmul.f32 %v3924_v51, %v3924_v51  ;;  %vm3981_vm1 = vmor %vm1135_vm0, %vm1136_vm15  ;;  %vm1145_vm3 = vweird.f32 %v3926_v3 }
 0x243   : > { %v1128_v5 = vsel %vm1127_vm14, %v3189_v37, %v1124_v20  ;;  %v1131_v62 = vmul.f32 %v3920_v52, %v1130_v23  ;;  %v2951_v49 = vld [vmem:[#allocation2 + $0x48] sm:$0xff] }
 0x244   : > { %v1518_v39 = vmul.f32 %v1128_v5, %v3749_v40  ;;  %871 = vadd.xlane.f32.xlu0 %v806_v1  ;;  %636 = vadd.xlane.f32.xlu2 %v3939_v19 }
 0x245   : > { %v1132_v12 = vmul.f32 0.5, %v1131_v62  ;;  %v627_v16 = vpop.xlane.xlu2 %626  ;;  %v862_v27 = vpop.xlane.xlu0 %861  ;;  %2132 = vmatmul.bf16.gmra.mxu1 %v2951_v49  ;;  %2261 = vmatmul.bf16.gmra.mxu2 %v2951_v49 }
 0x246   : > { %v1570_v37 = vmul.f32 %v3743_v25, %v1518_v39  ;;  %v711_v36 = vmul.f32 %v3457_v0, %v627_v16  ;;  %v945_v26 = vmul.f32 %v862_v27, %v3457_v0  ;;  %2390 = vmatmul.bf16.gmra.mxu3 %v2951_v49  ;;  %v4007_v27 = vld [vmem:[%s3377_s19 + $0x120] sm:$0xff] }
 0x247   : > { %v1133_v40 = vsub.f32 1.5, %v1132_v12 }
 0x248   : > { %v3193_v31 = vpop.eup %3192  ;;  %v1622_v43 = vadd.f32 %v3770_v17, %v1570_v37  ;;  %v3969_v32 = vsub.f32 %v3830_v60, %v711_v36  ;;  %v3971_v33 = vadd.f32 1e-05, %v945_v26  ;;  %v2118_v14 = vpop.f32.mrf.mxu1  ;;  %v4010_v37 = vld [vmem:[%s3377_s19 + $0x128] sm:$0xff] }
 0x249   : > { %v1134_v21 = vmul.f32 %v3920_v52, %v1133_v40  ;;  %v1140_v41 = vmul.f32 %v3193_v31, %v3926_v3  ;;  %2496 = vst [vmem:[%s3961_s13] sm:$0xff] %v2118_v14  ;;  %vm1146_vm2 = vweird.f32 %v3193_v31  ;;  %v485_v40 = vpop.f32.mrf.mxu0 }
 0x24a   : > { %v3019_v9 = vpack.c.bf16 %v1622_v43, %v1621_v58  ;;  %3194 = vrsqrt.f32 %v3971_v33  ;;  %v807_v28 = vmul.f32 %v3969_v32, %v3969_v32  ;;  %vm1147_vm4 = vmor %vm1145_vm3, %vm1146_vm2  ;;  %v339_v58 = vpack.c.bf16 %v4010_v37, %v4007_v27 }
 0x24b   : > { %v1141_v60 = vmul.f32 %v3193_v31, %v1140_v41  ;;  %v1138_v63 = vsel %vm3981_vm1, %v3920_v52, %v1134_v21  ;;  %v484_v21 = vadd.f32 %v483_v42, %v3759_v4  ;;  %vm1155_vm6 = vweird.f32 %v3971_v33 }
 0x24c   : > { %3119 = vst [vmem:[#allocation2 + $0x60] sm:$0xff] %v3019_v9   ;;  %873 = vadd.xlane.f32.xlu0 %v807_v28  ;;  %638 = vadd.xlane.f32.xlu2 %v3964_v11  ;;  %v1519_v52 = vmul.f32 %v1138_v63, %v3786_v24  ;;  %v4015_v24 = vadd.f32 %v3936_v46, %v481_v47 }
 0x24d   : > { %v1142_v20 = vmul.f32 0.5, %v1141_v60  ;;  %v864_v23 = vpop.xlane.xlu1 %863  ;;  %v629_v1 = vpop.xlane.xlu0 %628  ;;  %507 = vmatmul.bf16.gmra.mxu0 %v339_v58  ;;  %v4038_v47 = vadd.f32 %v3936_v46, %v484_v21  ;;  %v4059_v58 = vld [vmem:[%s3377_s19 + $0x130] sm:$0xff] }
 0x24e   : > { %v946_v5 = vmul.f32 %v864_v23, %v3457_v0  ;;  %v712_v62 = vmul.f32 %v3457_v0, %v629_v1  ;;  %v2247_v50 = vpop.f32.mrf.mxu2  ;;  %v1571_v43 = vmul.f32 %v3743_v25, %v1519_v52  ;;  %v486_v52 = vadd.f32 %v485_v40, %v3762_v15 }
 0x24f   : > { %v1143_v49 = vsub.f32 1.5, %v1142_v20  ;;  %2497 = vst [vmem:[%s3961_s13 + $0x8] sm:$0xff] %v2247_v50  ;;  %v2376_v13 = vpop.f32.mrf.mxu3 }
 0x250   : > { %v3993_v48 = vpop.eup %3194  ;;  %v3996_v39 = vadd.f32 1e-05, %v946_v5  ;;  %v3999_v38 = vsub.f32 %v3849_v29, %v712_v62  ;;  %2498 = vst [vmem:[%s3961_s13 + $0x10] sm:$0xff] %v2376_v13  ;;  %v2120_v34 = vpop.f32.mrf.mxu1  ;;  %v1623_v4 = vadd.f32 %v3770_v17, %v1571_v43  ;;  %v4062_v43 = vld [vmem:[%s3377_s19 + $0x138] sm:$0xff] }
 0x251   : > { %v1144_v12 = vmul.f32 %v3193_v31, %v1143_v49  ;;  %v1150_v16 = vmul.f32 %v3993_v48, %v3971_v33  ;;  %2499 = vst [vmem:[%s3961_s13 + $0x18] sm:$0xff] %v2120_v34  ;;  %vm1156_vm5 = vweird.f32 %v3993_v48 }
 0x252   : > { %3196 = vrsqrt.f32 %v3996_v39  ;;  %v808_v29 = vmul.f32 %v3999_v38, %v3999_v38  ;;  %vm4047_vm7 = vmor %vm1155_vm6, %vm1156_vm5  ;;  %vm1165_vm9 = vweird.f32 %v3996_v39 }
 0x253   : > { %v1148_v36 = vsel %vm1147_vm4, %v3193_v31, %v1144_v12  ;;  %v1151_v3 = vmul.f32 %v3993_v48, %v1150_v16  ;;  %v2952_v26 = vld [vmem:[#allocation2 + $0x60] sm:$0xff]  ;;  %v488_v16 = vpop.f32.mrf.mxu0 }
 0x254   : > { %v1520_v14 = vmul.f32 %v1148_v36, %v3799_v6  ;;  %640 = vadd.xlane.f32.xlu0 %v4015_v24  ;;  %875 = vadd.xlane.f32.xlu1 %v808_v29 }
 0x255   : > { %v1152_v41 = vmul.f32 0.5, %v1151_v3  ;;  %v4026_v9 = vpop.xlane.xlu1 %865  ;;  %v631_v31 = vpop.xlane.xlu0 %630  ;;  %2137 = vmatmul.bf16.gmra.mxu1 %v2952_v26  ;;  %2266 = vmatmul.bf16.gmra.mxu2 %v2952_v26 }
 0x256   : > { %v1572_v28 = vmul.f32 %v3743_v25, %v1520_v14  ;;  %v713_v60 = vmul.f32 %v3457_v0, %v631_v31  ;;  %2395 = vmatmul.bf16.gmra.mxu3 %v2952_v26  ;;  %v2249_v22 = vpop.f32.mrf.mxu2  ;;  %v4070_v14 = vadd.f32 %v3936_v46, %v486_v52  ;;  %v340_v31 = vpack.c.bf16 %v4062_v43, %v4059_v58 }
 0x257   : > { %v1153_v6 = vsub.f32 1.5, %v1152_v41  ;;  %2500 = vst [vmem:[%s3961_s13 + $0x20] sm:$0xff] %v2249_v22  ;;  %v2378_v63 = vpop.f32.mrf.mxu3 }
 0x258   : > { %v3197_v20 = vpop.eup %3196  ;;  %v1624_v42 = vadd.f32 %v3770_v17, %v1572_v28  ;;  %v4034_v23 = vsub.f32 %v3867_v56, %v713_v60  ;;  %2501 = vst [vmem:[%s3961_s13 + $0x28] sm:$0xff] %v2378_v63  ;;  %v2123_v1 = vpop.f32.mrf.mxu1 }
 0x259   : > { %v1154_v5 = vmul.f32 %v3993_v48, %v1153_v6  ;;  %v1160_v62 = vmul.f32 %v3197_v20, %v3996_v39  ;;  %2502 = vst [vmem:[%s3961_s13 + $0x30] sm:$0xff] %v2123_v1  ;;  %vm1166_vm8 = vweird.f32 %v3197_v20  ;;  %v489_v39 = vadd.f32 %v488_v16, %v3802_v18 }
 0x25a   : > { %v3024_v50 = vpack.c.bf16 %v1624_v42, %v1623_v4  ;;  %v809_v49 = vmul.f32 %v4034_v23, %v4034_v23  ;;  %vm1167_vm10 = vmor %vm1165_vm9, %vm1166_vm8 }
 0x25b   : > { %v1161_v56 = vmul.f32 %v3197_v20, %v1160_v62  ;;  %v1158_v34 = vsel %vm4047_vm7, %v3993_v48, %v1154_v5  ;;  %v4092_v62 = vadd.f32 %v3936_v46, %v489_v39 }
 0x25c   : > { %3120 = vst [vmem:[#allocation2 + $0x28] sm:$0xff] %v3024_v50   ;;  %642 = vadd.xlane.f32.xlu0 %v4038_v47  ;;  %877 = vadd.xlane.f32.xlu1 %v809_v49  ;;  %v1521_v15 = vmul.f32 %v1158_v34, %v3827_v10 }
 0x25d   : > { %v1162_v12 = vmul.f32 0.5, %v1161_v56  ;;  %v633_v33 = vpop.xlane.xlu1 %632  ;;  %512 = vmatmul.bf16.gmra.mxu0 %v340_v31 }
 0x25e   : > { %v714_v29 = vmul.f32 %v3457_v0, %v633_v33  ;;  %v2252_v36 = vpop.f32.mrf.mxu2  ;;  %v1573_v28 = vmul.f32 %v3743_v25, %v1521_v15 }
 0x25f   : > { %v1163_v3 = vsub.f32 1.5, %v1162_v12  ;;  %2503 = vst [vmem:[%s3961_s13 + $0x38] sm:$0xff] %v2252_v36  ;;  %v2381_v26 = vpop.f32.mrf.mxu3 }
 0x260   : > { %v4066_v40 = vsub.f32 %v3874_v35, %v714_v29  ;;  %2504 = vst [vmem:[%s3961_s13 + $0x40] sm:$0xff] %v2381_v26  ;;  %v2125_v48 = vpop.f32.mrf.mxu1  ;;  %v1625_v42 = vadd.f32 %v3770_v17, %v1573_v28 }
 0x261   : > { %v1164_v21 = vmul.f32 %v3197_v20, %v1163_v3  ;;  %2505 = vst [vmem:[%s3961_s13 + $0x48] sm:$0xff] %v2125_v48  ;;  %v947_v3 = vmul.f32 %v4026_v9, %v3457_v0 }
 0x262   : > { %v810_v41 = vmul.f32 %v4066_v40, %v4066_v40 }
 0x263   : > { %v1168_v10 = vsel %vm1167_vm10, %v3197_v20, %v1164_v21  ;;  %v2953_v35 = vld [vmem:[#allocation2 + $0x28] sm:$0xff]  ;;  %v995_v26 = vadd.f32 1e-05, %v947_v3 }
 0x264   : > { %v1522_v60 = vmul.f32 %v1168_v10, %v3846_v55  ;;  %879 = vadd.xlane.f32.xlu2 %v810_v41  ;;  %644 = vadd.xlane.f32.xlu1 %v4070_v14  ;;  %v490_v55 = vpop.f32.mrf.mxu0 }
 0x265   : > { %v635_v22 = vpop.xlane.xlu1 %634  ;;  %2142 = vmatmul.bf16.gmra.mxu1 %v2953_v35  ;;  %2271 = vmatmul.bf16.gmra.mxu2 %v2953_v35  ;;  %v491_v56 = vadd.f32 %v490_v55, %v3805_v53  ;;  %3198 = vrsqrt.f32 %v995_v26  ;;  %vm1175_vm12 = vweird.f32 %v995_v26 }
 0x266   : > { %v1574_v6 = vmul.f32 %v3743_v25, %v1522_v60  ;;  %v715_v63 = vmul.f32 %v3457_v0, %v635_v22  ;;  %2400 = vmatmul.bf16.gmra.mxu3 %v2953_v35  ;;  %v2254_v20 = vpop.f32.mrf.mxu2 }
 0x267   : > { %2506 = vst [vmem:[%s3961_s13 + $0x50] sm:$0xff] %v2254_v20  ;;  %v2383_v4 = vpop.f32.mrf.mxu3  ;;  %v4102_v34 = vadd.f32 %v3936_v46, %v491_v56  ;;  %v4121_v20 = vld [vmem:[%s3377_s19 + $0x148] sm:$0xff] }
 0x268   : > { %v1626_v18 = vadd.f32 %v3770_v17, %v1574_v6  ;;  %v4088_v1 = vsub.f32 %v3879_v44, %v715_v63  ;;  %2507 = vst [vmem:[%s3961_s13 + $0x58] sm:$0xff] %v2383_v4  ;;  %v2128_v5 = vpop.f32.mrf.mxu1  ;;  %v4118_v63 = vld [vmem:[%s3377_s19 + $0x140] sm:$0xff] }
 0x269   : > { %2508 = vst [vmem:[%s3961_s13 + $0x60] sm:$0xff] %v2128_v5  ;;  %v341_v55 = vpack.c.bf16 %v4121_v20, %v4118_v63 }
 0x26a   : > { %v3029_v50 = vpack.c.bf16 %v1626_v18, %v1625_v42  ;;  %v811_v49 = vmul.f32 %v4088_v1, %v4088_v1 }
 0x26b   : > { %v3199_v15 = vpop.eup %3198 }
 0x26c   : > { %3121 = vst [vmem:[#allocation2 + $0x40] sm:$0xff] %v3029_v50   ;;  %881 = vadd.xlane.f32.xlu2 %v811_v49  ;;  %646 = vadd.xlane.f32.xlu1 %v4092_v62  ;;  %v493_v12 = vpop.f32.mrf.mxu0  ;;  %v1170_v48 = vmul.f32 %v3199_v15, %v995_v26  ;;  %vm1176_vm11 = vweird.f32 %v3199_v15 }
 0x26d   : > { %v494_v16 = vadd.f32 %v493_v12, %v3839_v59  ;;  %vm1177_vm13 = vmor %vm1175_vm12, %vm1176_vm11  ;;  %517 = vmatmul.bf16.gmra.mxu0 %v341_v55 }
 0x26e   : > { %v2257_v44 = vpop.f32.mrf.mxu2  ;;  %v1171_v59 = vmul.f32 %v3199_v15, %v1170_v48 }
 0x26f   : > { %2509 = vst [vmem:[%s3961_s13 + $0x68] sm:$0xff] %v2257_v44  ;;  %v2386_v13 = vpop.f32.mrf.mxu3  ;;  %v4110_v36 = vadd.f32 %v3936_v46, %v494_v16 }
 0x270   : > { %2510 = vst [vmem:[%s3961_s13 + $0x70] sm:$0xff] %v2386_v13  ;;  %v2130_v52 = vpop.f32.mrf.mxu1  ;;  %v1172_v10 = vmul.f32 0.5, %v1171_v59 }
 0x271   : > { %2511 = vst [vmem:[%s3961_s13 + $0x78] sm:$0xff] %v2130_v52 }
 0x272   : > { %v1173_v35 = vsub.f32 1.5, %v1172_v10 }
 0x273   : > { %v2954_v33 = vld [vmem:[#allocation2 + $0x40] sm:$0xff] }
 0x274   : > { %648 = vadd.xlane.f32.xlu2 %v4102_v34  ;;  %v1174_v9 = vmul.f32 %v3199_v15, %v1173_v35  ;;  %v495_v42 = vpop.f32.mrf.mxu0 }
 0x275   : > { %2147 = vmatmul.bf16.gmra.mxu1 %v2954_v33  ;;  %2276 = vmatmul.bf16.gmra.mxu2 %v2954_v33 }
 0x276   : > { %2405 = vmatmul.bf16.gmra.mxu3 %v2954_v33  ;;  %v2259_v53 = vpop.f32.mrf.mxu2  ;;  %v1178_v18 = vsel %vm1177_vm13, %v3199_v15, %v1174_v9 }
 0x277   : > { %2512 = vst [vmem:[%s3961_s13 + $0x80] sm:$0xff] %v2259_v53  ;;  %v2388_v29 = vpop.f32.mrf.mxu3  ;;  %v1523_v12 = vmul.f32 %v1178_v18, %v3864_v54 }
 0x278   : > { %2513 = vst [vmem:[%s3961_s13 + $0x88] sm:$0xff] %v2388_v29 }
 0x279   : > { %v1575_v48 = vmul.f32 %v3743_v25, %v1523_v12 }
 0x27c   : > { %650 = vadd.xlane.f32.xlu2 %v4110_v36 }
 0x2a7   : > { %v868_v21 = vpop.xlane.xlu2 %867 }
 0x2a8   : > { %v948_v41 = vmul.f32 %v868_v21, %v3457_v0 }
 0x2aa   : > { %v996_v31 = vadd.f32 1e-05, %v948_v41 }
 0x2ac   : > { %3200 = vrsqrt.f32 %v996_v31  ;;  %vm1185_vm15 = vweird.f32 %v996_v31 }
 0x2af   : > { %v870_v28 = vpop.xlane.xlu2 %869 }
 0x2b0   : > { %v949_v60 = vmul.f32 %v870_v28, %v3457_v0  ;;  %v498_v28 = vpop.f32.mrf.mxu0 }
 0x2b2   : > { %v3201_v39 = vpop.eup %3200  ;;  %v997_v22 = vadd.f32 1e-05, %v949_v60 }
 0x2b3   : > { %v1180_v6 = vmul.f32 %v3201_v39, %v996_v31  ;;  %vm1186_vm14 = vweird.f32 %v3201_v39 }
 0x2b4   : > { %3202 = vrsqrt.f32 %v997_v22  ;;  %vm1187_vm0 = vmor %vm1185_vm15, %vm1186_vm14  ;;  %vm1195_vm2 = vweird.f32 %v997_v22 }
 0x2b5   : > { %v1181_v4 = vmul.f32 %v3201_v39, %v1180_v6 }
 0x2b7   : > { %v1182_v5 = vmul.f32 0.5, %v1181_v4  ;;  %v637_v50 = vpop.xlane.xlu2 %636  ;;  %v872_v49 = vpop.xlane.xlu0 %871 }
 0x2b8   : > { %v716_v56 = vmul.f32 %v3457_v0, %v637_v50  ;;  %v950_v44 = vmul.f32 %v872_v49, %v3457_v0 }
 0x2b9   : > { %v1183_v13 = vsub.f32 1.5, %v1182_v5 }
 0x2ba   : > { %v3203_v52 = vpop.eup %3202  ;;  %v4129_v33 = vsub.f32 %v3939_v19, %v716_v56  ;;  %v998_v16 = vadd.f32 1e-05, %v950_v44  ;;  %v496_v44 = vadd.f32 %v495_v42, %v3842_v8 }
 0x2bb   : > { %v1184_v53 = vmul.f32 %v3201_v39, %v1183_v13  ;;  %v1190_v29 = vmul.f32 %v3203_v52, %v997_v22  ;;  %vm1196_vm1 = vweird.f32 %v3203_v52 }
 0x2bc   : > { %3204 = vrsqrt.f32 %v998_v16  ;;  %v812_v3 = vmul.f32 %v4129_v33, %v4129_v33  ;;  %vm1197_vm3 = vmor %vm1195_vm2, %vm1196_vm1  ;;  %vm1205_vm5 = vweird.f32 %v998_v16 }
 0x2bd   : > { %v1188_v26 = vsel %vm1187_vm0, %v3201_v39, %v1184_v53  ;;  %v1191_v15 = vmul.f32 %v3203_v52, %v1190_v29  ;;  %v1627_v39 = vadd.f32 %v3770_v17, %v1575_v48 }
 0x2be   : > { %v1524_v59 = vmul.f32 %v1188_v26, %v3898_v61  ;;  %883 = vadd.xlane.f32.xlu0 %v812_v3 }
 0x2bf   : > { %v1192_v54 = vmul.f32 0.5, %v1191_v15  ;;  %v639_v21 = vpop.xlane.xlu2 %638  ;;  %v874_v19 = vpop.xlane.xlu0 %873 }
 0x2c0   : > { %v1576_v41 = vmul.f32 %v3743_v25, %v1524_v59  ;;  %v717_v31 = vmul.f32 %v3457_v0, %v639_v21  ;;  %v951_v10 = vmul.f32 %v874_v19, %v3457_v0  ;;  %v500_v59 = vpop.f32.mrf.mxu0  ;;  %v4175_v21 = vld [vmem:[%s3377_s19 + $0x158] sm:$0xff] }
 0x2c1   : > { %v1193_v35 = vsub.f32 1.5, %v1192_v54  ;;  %v4167_v54 = vadd.f32 %v3936_v46, %v496_v44 }
 0x2c2   : > { %v3205_v60 = vpop.eup %3204  ;;  %v1628_v9 = vadd.f32 %v3770_v17, %v1576_v41  ;;  %v4141_v61 = vsub.f32 %v3964_v11, %v717_v31  ;;  %v4143_v6 = vadd.f32 1e-05, %v951_v10  ;;  %v2133_v4 = vpop.f32.mrf.mxu1  ;;  %v499_v41 = vadd.f32 %v498_v28, %v3887_v45 }
 0x2c3   : > { %v1194_v55 = vmul.f32 %v3203_v52, %v1193_v35  ;;  %v1200_v25 = vmul.f32 %v3205_v60, %v998_v16  ;;  %2514 = vst [vmem:[%s3961_s13 + $0x90] sm:$0xff] %v2133_v4  ;;  %vm1206_vm4 = vweird.f32 %v3205_v60  ;;  %v4184_v35 = vld [vmem:[%s4803_s3] ss:$0 sm:$0xff] }
 0x2c4   : > { %v3034_v18 = vpack.c.bf16 %v1628_v9, %v1627_v39  ;;  %3206 = vrsqrt.f32 %v4143_v6  ;;  %v813_v5 = vmul.f32 %v4141_v61, %v4141_v61  ;;  %vm1207_vm6 = vmor %vm1205_vm5, %vm1206_vm4  ;;  %vm1215_vm8 = vweird.f32 %v4143_v6 }
 0x2c5   : > { %v1201_v50 = vmul.f32 %v3205_v60, %v1200_v25  ;;  %v1198_v17 = vsel %vm1197_vm3, %v3203_v52, %v1194_v55 }
 0x2c6   : > { %3122 = vst [vmem:[#allocation2 + $0x78] sm:$0xff] %v3034_v18   ;;  %885 = vadd.xlane.f32.xlu0 %v813_v5  ;;  %v1525_v52 = vmul.f32 %v1198_v17, %v3912_v7 }
 0x2c7   : > { %v1202_v11 = vmul.f32 0.5, %v1201_v50  ;;  %v876_v49 = vpop.xlane.xlu1 %875  ;;  %v641_v56 = vpop.xlane.xlu0 %640  ;;  %v4194_v50 = vadd.f32 %v3936_v46, %v499_v41 }
 0x2c8   : > { %v952_v13 = vmul.f32 %v876_v49, %v3457_v0  ;;  %v718_v12 = vmul.f32 %v3457_v0, %v641_v56  ;;  %v2262_v53 = vpop.f32.mrf.mxu2  ;;  %v1577_v39 = vmul.f32 %v4184_v35, %v1525_v52 }
 0x2c9   : > { %v1203_v29 = vsub.f32 1.5, %v1202_v11  ;;  %2515 = vst [vmem:[%s3961_s13 + $0x98] sm:$0xff] %v2262_v53  ;;  %v2391_v22 = vpop.f32.mrf.mxu3  ;;  %v4199_v11 = vld [vmem:[%s4804_s4] ss:$0 sm:$0xff] }
 0x2ca   : > { %v4153_v3 = vpop.eup %3206  ;;  %v4156_v26 = vadd.f32 1e-05, %v952_v13  ;;  %v4159_v8 = vsub.f32 %v4015_v24, %v718_v12  ;;  %2516 = vst [vmem:[%s3961_s13 + $0xa0] sm:$0xff] %v2391_v22  ;;  %v2135_v42 = vpop.f32.mrf.mxu1  ;;  %v4172_v24 = vld [vmem:[%s3377_s19 + $0x150] sm:$0xff]  ;;  %v1629_v49 = vadd.f32 %v4199_v11, %v1577_v39 }
 0x2cb   : > { %v1204_v15 = vmul.f32 %v3205_v60, %v1203_v29  ;;  %v1210_v48 = vmul.f32 %v4153_v3, %v4143_v6  ;;  %2517 = vst [vmem:[%s3961_s13 + $0xa8] sm:$0xff] %v2135_v42  ;;  %v342_v10 = vpack.c.bf16 %v4175_v21, %v4172_v24  ;;  %vm1216_vm7 = vweird.f32 %v4153_v3  ;;  %v503_v22 = vpop.f32.mrf.mxu0 }
 0x2cc   : > { %3208 = vrsqrt.f32 %v4156_v26  ;;  %v814_v7 = vmul.f32 %v4159_v8, %v4159_v8  ;;  %vm4217_vm9 = vmor %vm1215_vm8, %vm1216_vm7  ;;  %v501_v6 = vadd.f32 %v500_v59, %v3890_v30  ;;  %vm1225_vm11 = vweird.f32 %v4156_v26 }
 0x2cd   : > { %v1208_v19 = vsel %vm1207_vm6, %v3205_v60, %v1204_v15  ;;  %v1211_v16 = vmul.f32 %v4153_v3, %v1210_v48  ;;  %v2955_v31 = vld [vmem:[#allocation2 + $0x78] sm:$0xff]  ;;  %522 = vmatmul.bf16.gmra.mxu0 %v342_v10 }
 0x2ce   : > { %v1526_v9 = vmul.f32 %v1208_v19, %v3924_v51  ;;  %652 = vadd.xlane.f32.xlu0 %v4167_v54  ;;  %887 = vadd.xlane.f32.xlu1 %v814_v7 }
 0x2cf   : > { %v1212_v60 = vmul.f32 0.5, %v1211_v16  ;;  %v878_v4 = vpop.xlane.xlu1 %877  ;;  %v643_v45 = vpop.xlane.xlu0 %642  ;;  %2152 = vmatmul.bf16.gmra.mxu1 %v2955_v31  ;;  %2281 = vmatmul.bf16.gmra.mxu2 %v2955_v31 }
 0x2d0   : > { %v1578_v28 = vmul.f32 %v4184_v35, %v1526_v9  ;;  %v953_v55 = vmul.f32 %v878_v4, %v3457_v0  ;;  %v719_v25 = vmul.f32 %v3457_v0, %v643_v45  ;;  %2410 = vmatmul.bf16.gmra.mxu3 %v2955_v31  ;;  %v2264_v18 = vpop.f32.mrf.mxu2 }
 0x2d1   : > { %v1213_v51 = vsub.f32 1.5, %v1212_v60  ;;  %2518 = vst [vmem:[%s3961_s13 + $0xb0] sm:$0xff] %v2264_v18  ;;  %v2393_v5 = vpop.f32.mrf.mxu3 }
 0x2d2   : > { %v3209_v17 = vpop.eup %3208  ;;  %v1630_v56 = vadd.f32 %v4199_v11, %v1578_v28  ;;  %v4203_v44 = vadd.f32 1e-05, %v953_v55  ;;  %v4206_v13 = vsub.f32 %v4038_v47, %v719_v25  ;;  %2519 = vst [vmem:[%s3961_s13 + $0xb8] sm:$0xff] %v2393_v5  ;;  %v2138_v12 = vpop.f32.mrf.mxu1  ;;  %v4243_v55 = vld [vmem:[%s3377_s19 + $0x160] sm:$0xff]  ;;  %v4246_v25 = vld [vmem:[%s3377_s19 + $0x168] sm:$0xff] }
 0x2d3   : > { %v1214_v53 = vmul.f32 %v4153_v3, %v1213_v51  ;;  %v1220_v29 = vmul.f32 %v3209_v17, %v4156_v26  ;;  %2520 = vst [vmem:[%s3961_s13 + $0xc0] sm:$0xff] %v2138_v12  ;;  %vm1226_vm10 = vweird.f32 %v3209_v17  ;;  %v505_v5 = vpop.f32.mrf.mxu0 }
 0x2d4   : > { %v3039_v52 = vpack.c.bf16 %v1630_v56, %v1629_v49  ;;  %3210 = vrsqrt.f32 %v4203_v44  ;;  %v815_v42 = vmul.f32 %v4206_v13, %v4206_v13  ;;  %vm1227_vm12 = vmor %vm1225_vm11, %vm1226_vm10  ;;  %v343_v49 = vpack.c.bf16 %v4246_v25, %v4243_v55 }
 0x2d5   : > { %v1221_v47 = vmul.f32 %v3209_v17, %v1220_v29  ;;  %v1218_v48 = vsel %vm4217_vm9, %v4153_v3, %v1214_v53  ;;  %v504_v53 = vadd.f32 %v503_v22, %v3943_v57  ;;  %vm1235_vm14 = vweird.f32 %v4203_v44 }
 0x2d6   : > { %3123 = vst [vmem:[#allocation2 + $0x88] sm:$0xff] %v3039_v52   ;;  %654 = vadd.xlane.f32.xlu0 %v4194_v50  ;;  %889 = vadd.xlane.f32.xlu1 %v815_v42  ;;  %v1527_v3 = vmul.f32 %v1218_v48, %v3969_v32 }
 0x2d7   : > { %v1222_v7 = vmul.f32 0.5, %v1221_v47  ;;  %v880_v19 = vpop.xlane.xlu2 %879  ;;  %v645_v16 = vpop.xlane.xlu1 %644 }
 0x2d8   : > { %v954_v41 = vmul.f32 %v880_v19, %v3457_v0  ;;  %v720_v31 = vmul.f32 %v3457_v0, %v645_v16  ;;  %v2267_v10 = vpop.f32.mrf.mxu2  ;;  %v1579_v56 = vmul.f32 %v4184_v35, %v1527_v3  ;;  %v506_v3 = vadd.f32 %v505_v5, %v3946_v2 }
 0x2d9   : > { %v1223_v39 = vsub.f32 1.5, %v1222_v7  ;;  %2521 = vst [vmem:[%s3961_s13 + $0xc8] sm:$0xff] %v2267_v10  ;;  %v2396_v9 = vpop.f32.mrf.mxu3 }
 0x2da   : > { %v4229_v60 = vpop.eup %3210  ;;  %v4232_v4 = vadd.f32 1e-05, %v954_v41  ;;  %v4235_v30 = vsub.f32 %v4070_v14, %v720_v31  ;;  %2522 = vst [vmem:[%s3961_s13 + $0xd0] sm:$0xff] %v2396_v9  ;;  %v2140_v59 = vpop.f32.mrf.mxu1  ;;  %v4253_v14 = vadd.f32 %v3936_v46, %v501_v6  ;;  %v1631_v57 = vadd.f32 %v4199_v11, %v1579_v56  ;;  %v4298_v56 = vld [vmem:[%s3377_s19 + $0x178] sm:$0xff] }
 0x2db   : > { %v1224_v45 = vmul.f32 %v3209_v17, %v1223_v39  ;;  %v1230_v28 = vmul.f32 %v4229_v60, %v4203_v44  ;;  %2523 = vst [vmem:[%s3961_s13 + $0xd8] sm:$0xff] %v2140_v59  ;;  %v4274_v6 = vadd.f32 %v3936_v46, %v504_v53  ;;  %vm1236_vm13 = vweird.f32 %v4229_v60 }
 0x2dc   : > { %3212 = vrsqrt.f32 %v4232_v4  ;;  %v816_v32 = vmul.f32 %v4235_v30, %v4235_v30  ;;  %vm4283_vm15 = vmor %vm1235_vm14, %vm1236_vm13  ;;  %vm1245_vm1 = vweird.f32 %v4232_v4 }
 0x2dd   : > { %v1228_v18 = vsel %vm1227_vm12, %v3209_v17, %v1224_v45  ;;  %v1231_v26 = vmul.f32 %v4229_v60, %v1230_v28  ;;  %v2956_v51 = vld [vmem:[#allocation2 + $0x88] sm:$0xff]  ;;  %527 = vmatmul.bf16.gmra.mxu0 %v343_v49  ;;  %v508_v28 = vpop.f32.mrf.mxu0  ;;  %v4295_v49 = vld [vmem:[%s3377_s19 + $0x170] sm:$0xff] }
 0x2de   : > { %v1528_v12 = vmul.f32 %v1228_v18, %v3999_v38  ;;  %891 = vadd.xlane.f32.xlu2 %v816_v32  ;;  %656 = vadd.xlane.f32.xlu1 %v4253_v14 }
 0x2df   : > { %v1232_v29 = vmul.f32 0.5, %v1231_v26  ;;  %v4262_v52 = vpop.xlane.xlu2 %881  ;;  %v647_v17 = vpop.xlane.xlu1 %646  ;;  %2157 = vmatmul.bf16.gmra.mxu1 %v2956_v51  ;;  %2286 = vmatmul.bf16.gmra.mxu2 %v2956_v51 }
 0x2e0   : > { %v1580_v42 = vmul.f32 %v4184_v35, %v1528_v12  ;;  %v721_v47 = vmul.f32 %v3457_v0, %v647_v17  ;;  %2415 = vmatmul.bf16.gmra.mxu3 %v2956_v51  ;;  %v2269_v15 = vpop.f32.mrf.mxu2  ;;  %v4306_v12 = vadd.f32 %v3936_v46, %v506_v3  ;;  %v344_v17 = vpack.c.bf16 %v4298_v56, %v4295_v49 }
 0x2e1   : > { %v1233_v38 = vsub.f32 1.5, %v1232_v29  ;;  %2524 = vst [vmem:[%s3961_s13 + $0xe0] sm:$0xff] %v2269_v15  ;;  %v2398_v48 = vpop.f32.mrf.mxu3 }
 0x2e2   : > { %v3213_v7 = vpop.eup %3212  ;;  %v1632_v22 = vadd.f32 %v4199_v11, %v1580_v42  ;;  %v4270_v19 = vsub.f32 %v4092_v62, %v721_v47  ;;  %2525 = vst [vmem:[%s3961_s13 + $0xe8] sm:$0xff] %v2398_v48  ;;  %v2143_v16 = vpop.f32.mrf.mxu1 }
 0x2e3   : > { %v1234_v41 = vmul.f32 %v4229_v60, %v1233_v38  ;;  %v1240_v31 = vmul.f32 %v3213_v7, %v4232_v4  ;;  %2526 = vst [vmem:[%s3961_s13 + $0xf0] sm:$0xff] %v2143_v16  ;;  %vm1246_vm0 = vweird.f32 %v3213_v7  ;;  %v509_v4 = vadd.f32 %v508_v28, %v4007_v27 }
 0x2e4   : > { %v3044_v10 = vpack.c.bf16 %v1632_v22, %v1631_v57  ;;  %v817_v39 = vmul.f32 %v4270_v19, %v4270_v19  ;;  %vm1247_vm2 = vmor %vm1245_vm1, %vm1246_vm0 }
 0x2e5   : > { %v1241_v62 = vmul.f32 %v3213_v7, %v1240_v31  ;;  %v1238_v59 = vsel %vm4283_vm15, %v4229_v60, %v1234_v41  ;;  %v4328_v31 = vadd.f32 %v3936_v46, %v509_v4 }
 0x2e6   : > { %3124 = vst [vmem:[#allocation2 + $0x90] sm:$0xff] %v3044_v10   ;;  %893 = vadd.xlane.f32.xlu2 %v817_v39  ;;  %658 = vadd.xlane.f32.xlu1 %v4274_v6  ;;  %v1529_v2 = vmul.f32 %v1238_v59, %v4034_v23 }
 0x2e7   : > { %v1242_v45 = vmul.f32 0.5, %v1241_v62  ;;  %v649_v44 = vpop.xlane.xlu2 %648 }
 0x2e8   : > { %v722_v32 = vmul.f32 %v3457_v0, %v649_v44  ;;  %v2272_v18 = vpop.f32.mrf.mxu2  ;;  %v1581_v42 = vmul.f32 %v4184_v35, %v1529_v2 }
 0x2e9   : > { %v1243_v26 = vsub.f32 1.5, %v1242_v45  ;;  %2527 = vst [vmem:[%s3961_s13 + $0xf8] sm:$0xff] %v2272_v18  ;;  %v2401_v51 = vpop.f32.mrf.mxu3 }
 0x2ea   : > { %v4302_v5 = vsub.f32 %v4102_v34, %v722_v32  ;;  %2528 = vst [vmem:[%s3961_s13 + $0x100] sm:$0xff] %v2401_v51  ;;  %v2145_v60 = vpop.f32.mrf.mxu1  ;;  %v1633_v22 = vadd.f32 %v4199_v11, %v1581_v42 }
 0x2eb   : > { %v1244_v53 = vmul.f32 %v3213_v7, %v1243_v26  ;;  %2529 = vst [vmem:[%s3961_s13 + $0x108] sm:$0xff] %v2145_v60  ;;  %v955_v26 = vmul.f32 %v4262_v52, %v3457_v0 }
 0x2ec   : > { %v818_v29 = vmul.f32 %v4302_v5, %v4302_v5 }
 0x2ed   : > { %v1248_v23 = vsel %vm1247_vm2, %v3213_v7, %v1244_v53  ;;  %v2957_v34 = vld [vmem:[#allocation2 + $0x90] sm:$0xff]  ;;  %532 = vmatmul.bf16.gmra.mxu0 %v344_v17  ;;  %v1003_v51 = vadd.f32 1e-05, %v955_v26 }
 0x2ee   : > { %v1530_v47 = vmul.f32 %v1248_v23, %v4066_v40  ;;  %895 = vadd.xlane.f32.xlu0 %v818_v29  ;;  %660 = vadd.xlane.f32.xlu2 %v4306_v12  ;;  %v510_v40 = vpop.f32.mrf.mxu0 }
 0x2ef   : > { %v651_v15 = vpop.xlane.xlu2 %650  ;;  %2162 = vmatmul.bf16.gmra.mxu1 %v2957_v34  ;;  %2291 = vmatmul.bf16.gmra.mxu2 %v2957_v34  ;;  %v511_v62 = vadd.f32 %v510_v40, %v4010_v37  ;;  %3214 = vrsqrt.f32 %v1003_v51  ;;  %vm1255_vm4 = vweird.f32 %v1003_v51 }
 0x2f0   : > { %v1582_v38 = vmul.f32 %v4184_v35, %v1530_v47  ;;  %v723_v48 = vmul.f32 %v3457_v0, %v651_v15  ;;  %2420 = vmatmul.bf16.gmra.mxu3 %v2957_v34  ;;  %v2274_v7 = vpop.f32.mrf.mxu2 }
 0x2f1   : > { %2530 = vst [vmem:[%s3961_s13 + $0x110] sm:$0xff] %v2274_v7  ;;  %v2403_v57 = vpop.f32.mrf.mxu3  ;;  %v4338_v59 = vadd.f32 %v3936_v46, %v511_v62 }
 0x2f2   : > { %v1634_v27 = vadd.f32 %v4199_v11, %v1582_v38  ;;  %v4324_v16 = vsub.f32 %v4110_v36, %v723_v48  ;;  %2531 = vst [vmem:[%s3961_s13 + $0x118] sm:$0xff] %v2403_v57  ;;  %v2148_v41 = vpop.f32.mrf.mxu1 }
 0x2f3   : > { %2532 = vst [vmem:[%s3961_s13 + $0x120] sm:$0xff] %v2148_v41 }
 0x2f4   : > { %v3049_v10 = vpack.c.bf16 %v1634_v27, %v1633_v22  ;;  %v819_v39 = vmul.f32 %v4324_v16, %v4324_v16 }
 0x2f5   : > { %v3215_v2 = vpop.eup %3214 }
 0x2f6   : > { %3125 = vst [vmem:[#allocation2 + $0x18] sm:$0xff] %v3049_v10   ;;  %897 = vadd.xlane.f32.xlu0 %v819_v39  ;;  %662 = vadd.xlane.f32.xlu2 %v4328_v31  ;;  %v513_v45 = vpop.f32.mrf.mxu0  ;;  %v1250_v60 = vmul.f32 %v3215_v2, %v1003_v51  ;;  %vm1256_vm3 = vweird.f32 %v3215_v2 }
 0x2f7   : > { %v514_v28 = vadd.f32 %v513_v45, %v4059_v58  ;;  %vm1257_vm5 = vmor %vm1255_vm4, %vm1256_vm3 }
 0x2f8   : > { %v2277_v36 = vpop.f32.mrf.mxu2  ;;  %v1251_v58 = vmul.f32 %v3215_v2, %v1250_v60 }
 0x2f9   : > { %2533 = vst [vmem:[%s3961_s13 + $0x128] sm:$0xff] %v2277_v36  ;;  %v2406_v9 = vpop.f32.mrf.mxu3  ;;  %v4346_v18 = vadd.f32 %v3936_v46, %v514_v28 }
 0x2fa   : > { %2534 = vst [vmem:[%s3961_s13 + $0x130] sm:$0xff] %v2406_v9  ;;  %v2150_v3 = vpop.f32.mrf.mxu1  ;;  %v1252_v23 = vmul.f32 0.5, %v1251_v58 }
 0x2fb   : > { %2535 = vst [vmem:[%s3961_s13 + $0x138] sm:$0xff] %v2150_v3 }
 0x2fc   : > { %v1253_v34 = vsub.f32 1.5, %v1252_v23 }
 0x2fd   : > { %v2958_v44 = vld [vmem:[#allocation2 + $0x18] sm:$0xff] }
 0x2fe   : > { %664 = vadd.xlane.f32.xlu0 %v4338_v59  ;;  %v1254_v15 = vmul.f32 %v3215_v2, %v1253_v34  ;;  %v515_v48 = vpop.f32.mrf.mxu0 }
 0x2ff   : > { %2167 = vmatmul.bf16.gmra.mxu1 %v2958_v44  ;;  %2296 = vmatmul.bf16.gmra.mxu2 %v2958_v44 }
 0x300   : > { %2425 = vmatmul.bf16.gmra.mxu3 %v2958_v44  ;;  %v2279_v37 = vpop.f32.mrf.mxu2  ;;  %v1258_v7 = vsel %vm1257_vm5, %v3215_v2, %v1254_v15 }
 0x301   : > { %2536 = vst [vmem:[%s3961_s13 + $0x140] sm:$0xff] %v2279_v37  ;;  %v2408_v32 = vpop.f32.mrf.mxu3  ;;  %v1531_v62 = vmul.f32 %v1258_v7, %v4088_v1 }
 0x302   : > { %2537 = vst [vmem:[%s3961_s13 + $0x148] sm:$0xff] %v2408_v32 }
 0x303   : > { %v1583_v32 = vmul.f32 %v4184_v35, %v1531_v62 }
 0x305   : > { %v1635_v23 = vadd.f32 %v4199_v11, %v1583_v32 }
 0x306   : > { %666 = vadd.xlane.f32.xlu0 %v4346_v18 }
 0x331   : > { %v884_v53 = vpop.xlane.xlu0 %883 }
 0x332   : > { %v956_v29 = vmul.f32 %v884_v53, %v3457_v0 }
 0x334   : > { %v1004_v17 = vadd.f32 1e-05, %v956_v29  ;;  %v518_v29 = vpop.f32.mrf.mxu0 }
 0x336   : > { %3216 = vrsqrt.f32 %v1004_v17  ;;  %vm1265_vm7 = vweird.f32 %v1004_v17 }
 0x339   : > { %v886_v42 = vpop.xlane.xlu0 %885 }
 0x33a   : > { %v957_v46 = vmul.f32 %v886_v42, %v3457_v0 }
 0x33c   : > { %v3217_v47 = vpop.eup %3216  ;;  %v1005_v4 = vadd.f32 1e-05, %v957_v46  ;;  %v520_v32 = vpop.f32.mrf.mxu0 }
 0x33d   : > { %v1260_v52 = vmul.f32 %v3217_v47, %v1004_v17  ;;  %vm1266_vm6 = vweird.f32 %v3217_v47 }
 0x33e   : > { %3218 = vrsqrt.f32 %v1005_v4  ;;  %vm1267_vm8 = vmor %vm1265_vm7, %vm1266_vm6  ;;  %vm1275_vm10 = vweird.f32 %v1005_v4 }
 0x33f   : > { %v1261_v38 = vmul.f32 %v3217_v47, %v1260_v52 }
 0x341   : > { %v1262_v57 = vmul.f32 0.5, %v1261_v38  ;;  %v888_v40 = vpop.xlane.xlu1 %887  ;;  %v653_v22 = vpop.xlane.xlu0 %652 }
 0x342   : > { %v958_v27 = vmul.f32 %v888_v40, %v3457_v0  ;;  %v724_v41 = vmul.f32 %v3457_v0, %v653_v22 }
 0x343   : > { %v1263_v10 = vsub.f32 1.5, %v1262_v57 }
 0x344   : > { %v3219_v39 = vpop.eup %3218  ;;  %v1006_v36 = vadd.f32 1e-05, %v958_v27  ;;  %v4357_v9 = vsub.f32 %v4167_v54, %v724_v41  ;;  %v516_v27 = vadd.f32 %v515_v48, %v4062_v43 }
 0x345   : > { %v1264_v3 = vmul.f32 %v3217_v47, %v1263_v10  ;;  %v1270_v45 = vmul.f32 %v3219_v39, %v1005_v4  ;;  %vm1276_vm9 = vweird.f32 %v3219_v39 }
 0x346   : > { %3220 = vrsqrt.f32 %v1006_v36  ;;  %v820_v44 = vmul.f32 %v4357_v9, %v4357_v9  ;;  %vm1277_vm11 = vmor %vm1275_vm10, %vm1276_vm9  ;;  %vm1285_vm13 = vweird.f32 %v1006_v36 }
 0x347   : > { %v1268_v28 = vsel %vm1267_vm8, %v3217_v47, %v1264_v3  ;;  %v1271_v37 = vmul.f32 %v3219_v39, %v1270_v45 }
 0x348   : > { %v1532_v26 = vmul.f32 %v1268_v28, %v4129_v33  ;;  %899 = vadd.xlane.f32.xlu1 %v820_v44 }
 0x349   : > { %v1272_v1 = vmul.f32 0.5, %v1271_v37  ;;  %v890_v51 = vpop.xlane.xlu1 %889  ;;  %v655_v54 = vpop.xlane.xlu0 %654 }
 0x34a   : > { %v1584_v2 = vmul.f32 %v4184_v35, %v1532_v26  ;;  %v959_v60 = vmul.f32 %v890_v51, %v3457_v0  ;;  %v725_v58 = vmul.f32 %v3457_v0, %v655_v54  ;;  %v519_v51 = vadd.f32 %v518_v29, %v4118_v63 }
 0x34b   : > { %v1273_v53 = vsub.f32 1.5, %v1272_v1 }
 0x34c   : > { %v3221_v17 = vpop.eup %3220  ;;  %v1636_v34 = vadd.f32 %v4199_v11, %v1584_v2  ;;  %v4368_v42 = vadd.f32 1e-05, %v959_v60  ;;  %v4371_v33 = vsub.f32 %v4194_v50, %v725_v58  ;;  %v2153_v46 = vpop.f32.mrf.mxu1 }
 0x34d   : > { %v1274_v47 = vmul.f32 %v3219_v39, %v1273_v53  ;;  %v1280_v15 = vmul.f32 %v3221_v17, %v1006_v36  ;;  %2538 = vst [vmem:[%s3961_s13 + $0x150] sm:$0xff] %v2153_v46  ;;  %vm1286_vm12 = vweird.f32 %v3221_v17 }
 0x34e   : > { %v3054_v52 = vpack.c.bf16 %v1636_v34, %v1635_v23  ;;  %3222 = vrsqrt.f32 %v4368_v42  ;;  %v821_v38 = vmul.f32 %v4371_v33, %v4371_v33  ;;  %vm1287_vm14 = vmor %vm1285_vm13, %vm1286_vm12  ;;  %vm1295_vm0 = vweird.f32 %v4368_v42 }
 0x34f   : > { %v1281_v7 = vmul.f32 %v3221_v17, %v1280_v15  ;;  %v1278_v57 = vsel %vm1277_vm11, %v3219_v39, %v1274_v47 }
 0x350   : > { %3126 = vst [vmem:[#allocation2 + $0x98] sm:$0xff] %v3054_v52   ;;  %901 = vadd.xlane.f32.xlu1 %v821_v38  ;;  %v1533_v39 = vmul.f32 %v1278_v57, %v4141_v61 }
 0x351   : > { %v1282_v50 = vmul.f32 0.5, %v1281_v7  ;;  %v892_v40 = vpop.xlane.xlu2 %891  ;;  %v657_v22 = vpop.xlane.xlu1 %656 }
 0x352   : > { %v960_v41 = vmul.f32 %v892_v40, %v3457_v0  ;;  %v726_v10 = vmul.f32 %v3457_v0, %v657_v22  ;;  %v2282_v62 = vpop.f32.mrf.mxu2  ;;  %v1585_v2 = vmul.f32 %v4184_v35, %v1533_v39 }
 0x353   : > { %v1283_v3 = vsub.f32 1.5, %v1282_v50  ;;  %2539 = vst [vmem:[%s3961_s13 + $0x158] sm:$0xff] %v2282_v62  ;;  %v2411_v4 = vpop.f32.mrf.mxu3 }
 0x354   : > { %v4381_v45 = vpop.eup %3222  ;;  %v4384_v44 = vadd.f32 1e-05, %v960_v41  ;;  %v4387_v28 = vsub.f32 %v4253_v14, %v726_v10  ;;  %2540 = vst [vmem:[%s3961_s13 + $0x160] sm:$0xff] %v2411_v4  ;;  %v2155_v43 = vpop.f32.mrf.mxu1  ;;  %v4399_v14 = vld [vmem:[%s4802_s2] ss:$0 sm:$0xff]  ;;  %v1637_v52 = vadd.f32 %v4199_v11, %v1585_v2 }
 0x355   : > { %v1284_v48 = vmul.f32 %v3221_v17, %v1283_v3  ;;  %v1290_v37 = vmul.f32 %v4381_v45, %v4368_v42  ;;  %2541 = vst [vmem:[%s3961_s13 + $0x168] sm:$0xff] %v2155_v43  ;;  %v4402_v26 = vadd.f32 %v4399_v14, %v516_v27  ;;  %v4414_v47 = vadd.f32 %v4399_v14, %v519_v51  ;;  %v523_v27 = vpop.f32.mrf.mxu0 }
 0x356   : > { %3224 = vrsqrt.f32 %v4384_v44  ;;  %v822_v61 = vmul.f32 %v4387_v28, %v4387_v28  ;;  %vm1296_vm15 = vweird.f32 %v4381_v45  ;;  %v521_v42 = vadd.f32 %v520_v32, %v4121_v20 }
 0x357   : > { %v1288_v36 = vsel %vm1287_vm14, %v3221_v17, %v1284_v48  ;;  %v1291_v1 = vmul.f32 %v4381_v45, %v1290_v37  ;;  %v2959_v54 = vld [vmem:[#allocation2 + $0x98] sm:$0xff]  ;;  %vm4432_vm1 = vmor %vm1295_vm0, %vm1296_vm15  ;;  %vm1305_vm3 = vweird.f32 %v4384_v44 }
 0x358   : > { %v1534_v60 = vmul.f32 %v1288_v36, %v4159_v8  ;;  %903 = vadd.xlane.f32.xlu2 %v822_v61  ;;  %668 = vadd.xlane.f32.xlu1 %v4402_v26 }
 0x359   : > { %v1292_v58 = vmul.f32 0.5, %v1291_v1  ;;  %v894_v53 = vpop.xlane.xlu2 %893  ;;  %v659_v23 = vpop.xlane.xlu1 %658  ;;  %2172 = vmatmul.bf16.gmra.mxu1 %v2959_v54  ;;  %2301 = vmatmul.bf16.gmra.mxu2 %v2959_v54 }
 0x35a   : > { %v1586_v17 = vmul.f32 %v4184_v35, %v1534_v60  ;;  %v961_v34 = vmul.f32 %v894_v53, %v3457_v0  ;;  %v727_v63 = vmul.f32 %v3457_v0, %v659_v23  ;;  %2430 = vmatmul.bf16.gmra.mxu3 %v2959_v54  ;;  %v2284_v29 = vpop.f32.mrf.mxu2 }
 0x35b   : > { %v1293_v46 = vsub.f32 1.5, %v1292_v58  ;;  %2542 = vst [vmem:[%s3961_s13 + $0x170] sm:$0xff] %v2284_v29  ;;  %v2413_v8 = vpop.f32.mrf.mxu3 }
 0x35c   : > { %v3225_v15 = vpop.eup %3224  ;;  %v1638_v38 = vadd.f32 %v4199_v11, %v1586_v17  ;;  %v4418_v7 = vadd.f32 1e-05, %v961_v34  ;;  %v4421_v57 = vsub.f32 %v4274_v6, %v727_v63  ;;  %2543 = vst [vmem:[%s3961_s13 + $0x178] sm:$0xff] %v2413_v8  ;;  %v2158_v50 = vpop.f32.mrf.mxu1  ;;  %v524_v63 = vadd.f32 %v523_v27, %v4172_v24 }
 0x35d   : > { %v1294_v40 = vmul.f32 %v4381_v45, %v1293_v46  ;;  %v1300_v22 = vmul.f32 %v3225_v15, %v4384_v44  ;;  %2544 = vst [vmem:[%s3961_s13 + $0x180] sm:$0xff] %v2158_v50  ;;  %vm1306_vm2 = vweird.f32 %v3225_v15  ;;  %v525_v17 = vpop.f32.mrf.mxu0 }
 0x35e   : > { %v3059_v41 = vpack.c.bf16 %v1638_v38, %v1637_v52  ;;  %3226 = vrsqrt.f32 %v4418_v7  ;;  %v823_v10 = vmul.f32 %v4421_v57, %v4421_v57  ;;  %vm1307_vm4 = vmor %vm1305_vm3, %vm1306_vm2  ;;  %vm1315_vm6 = vweird.f32 %v4418_v7 }
 0x35f   : > { %v1301_v6 = vmul.f32 %v3225_v15, %v1300_v22  ;;  %v1298_v3 = vsel %vm4432_vm1, %v4381_v45, %v1294_v40 }
 0x360   : > { %3127 = vst [vmem:[#allocation2 + $0x38] sm:$0xff] %v3059_v41   ;;  %905 = vadd.xlane.f32.xlu2 %v823_v10  ;;  %670 = vadd.xlane.f32.xlu1 %v4414_v47  ;;  %v1535_v45 = vmul.f32 %v1298_v3, %v4206_v13  ;;  %v4480_v10 = vadd.f32 %v4399_v14, %v524_v63 }
 0x361   : > { %v1302_v4 = vmul.f32 0.5, %v1301_v6  ;;  %v661_v39 = vpop.xlane.xlu2 %660  ;;  %v896_v43 = vpop.xlane.xlu0 %895 }
 0x362   : > { %v728_v48 = vmul.f32 %v3457_v0, %v661_v39  ;;  %v962_v37 = vmul.f32 %v896_v43, %v3457_v0  ;;  %v2287_v61 = vpop.f32.mrf.mxu2  ;;  %v1587_v44 = vmul.f32 %v4184_v35, %v1535_v45  ;;  %v526_v39 = vadd.f32 %v525_v17, %v4175_v21 }
 0x363   : > { %v1303_v36 = vsub.f32 1.5, %v1302_v4  ;;  %2545 = vst [vmem:[%s3961_s13 + $0x188] sm:$0xff] %v2287_v61  ;;  %v2416_v1 = vpop.f32.mrf.mxu3 }
 0x364   : > { %v4444_v51 = vpop.eup %3226  ;;  %v4448_v54 = vsub.f32 %v4306_v12, %v728_v48  ;;  %v4450_v2 = vadd.f32 1e-05, %v962_v37  ;;  %2546 = vst [vmem:[%s3961_s13 + $0x190] sm:$0xff] %v2416_v1  ;;  %v2160_v20 = vpop.f32.mrf.mxu1  ;;  %v4461_v12 = vadd.f32 %v4399_v14, %v521_v42  ;;  %v1639_v24 = vadd.f32 %v4199_v11, %v1587_v44 }
 0x365   : > { %v1304_v32 = vmul.f32 %v3225_v15, %v1303_v36  ;;  %v1310_v60 = vmul.f32 %v4444_v51, %v4418_v7  ;;  %2547 = vst [vmem:[%s3961_s13 + $0x198] sm:$0xff] %v2160_v20  ;;  %vm1316_vm5 = vweird.f32 %v4444_v51  ;;  %v528_v37 = vpop.f32.mrf.mxu0 }
 0x366   : > { %3228 = vrsqrt.f32 %v4450_v2  ;;  %v824_v13 = vmul.f32 %v4448_v54, %v4448_v54  ;;  %vm1317_vm7 = vmor %vm1315_vm6, %vm1316_vm5  ;;  %vm1325_vm9 = vweird.f32 %v4450_v2 }
 0x367   : > { %v1308_v58 = vsel %vm1307_vm4, %v3225_v15, %v1304_v32  ;;  %v1311_v53 = vmul.f32 %v4444_v51, %v1310_v60  ;;  %v2960_v23 = vld [vmem:[#allocation2 + $0x38] sm:$0xff] }
 0x368   : > { %v1536_v34 = vmul.f32 %v1308_v58, %v4235_v30  ;;  %907 = vadd.xlane.f32.xlu0 %v824_v13  ;;  %672 = vadd.xlane.f32.xlu2 %v4461_v12 }
 0x369   : > { %v1312_v29 = vmul.f32 0.5, %v1311_v53  ;;  %v663_v46 = vpop.xlane.xlu2 %662  ;;  %v4468_v8 = vpop.xlane.xlu0 %897  ;;  %2177 = vmatmul.bf16.gmra.mxu1 %v2960_v23  ;;  %2306 = vmatmul.bf16.gmra.mxu2 %v2960_v23  ;;  %v529_v53 = vadd.f32 %v528_v37, %v4243_v55 }
 0x36a   : > { %v1588_v15 = vmul.f32 %v4184_v35, %v1536_v34  ;;  %v729_v52 = vmul.f32 %v3457_v0, %v663_v46  ;;  %2435 = vmatmul.bf16.gmra.mxu3 %v2960_v23  ;;  %v2289_v38 = vpop.f32.mrf.mxu2 }
 0x36b   : > { %v1313_v30 = vsub.f32 1.5, %v1312_v29  ;;  %2548 = vst [vmem:[%s3961_s13 + $0x1a0] sm:$0xff] %v2289_v38  ;;  %v2418_v50 = vpop.f32.mrf.mxu3 }
 0x36c   : > { %v3229_v40 = vpop.eup %3228  ;;  %v1640_v22 = vadd.f32 %v4199_v11, %v1588_v15  ;;  %v4476_v27 = vsub.f32 %v4328_v31, %v729_v52  ;;  %2549 = vst [vmem:[%s3961_s13 + $0x1a8] sm:$0xff] %v2418_v50  ;;  %v2163_v41 = vpop.f32.mrf.mxu1  ;;  %v4520_v15 = vadd.f32 %v4399_v14, %v529_v53 }
 0x36d   : > { %v1314_v6 = vmul.f32 %v4444_v51, %v1313_v30  ;;  %v1320_v62 = vmul.f32 %v3229_v40, %v4450_v2  ;;  %2550 = vst [vmem:[%s3961_s13 + $0x1b0] sm:$0xff] %v2163_v41  ;;  %vm1326_vm8 = vweird.f32 %v3229_v40 }
 0x36e   : > { %v3064_v3 = vpack.c.bf16 %v1640_v22, %v1639_v24  ;;  %v825_v4 = vmul.f32 %v4476_v27, %v4476_v27  ;;  %vm1327_vm10 = vmor %vm1325_vm9, %vm1326_vm8 }
 0x36f   : > { %v1321_v31 = vmul.f32 %v3229_v40, %v1320_v62  ;;  %v1318_v43 = vsel %vm1317_vm7, %v4444_v51, %v1314_v6  ;;  %v4500_v51 = vadd.f32 %v4399_v14, %v526_v39 }
 0x370   : > { %3128 = vst [vmem:[#allocation2 + $0x50] sm:$0xff] %v3064_v3   ;;  %909 = vadd.xlane.f32.xlu0 %v825_v4  ;;  %674 = vadd.xlane.f32.xlu2 %v4480_v10  ;;  %v1537_v45 = vmul.f32 %v1318_v43, %v4270_v19  ;;  %v963_v4 = vmul.f32 %v4468_v8, %v3457_v0 }
 0x371   : > { %v1322_v42 = vmul.f32 0.5, %v1321_v31  ;;  %v665_v48 = vpop.xlane.xlu0 %664 }
 0x372   : > { %v730_v61 = vmul.f32 %v3457_v0, %v665_v48  ;;  %v2292_v36 = vpop.f32.mrf.mxu2  ;;  %v1589_v19 = vmul.f32 %v4184_v35, %v1537_v45  ;;  %v1011_v31 = vadd.f32 1e-05, %v963_v4 }
 0x373   : > { %v1323_v1 = vsub.f32 1.5, %v1322_v42  ;;  %2551 = vst [vmem:[%s3961_s13 + $0x1b8] sm:$0xff] %v2292_v36  ;;  %v2421_v7 = vpop.f32.mrf.mxu3 }
 0x374   : > { %v4496_v20 = vsub.f32 %v4338_v59, %v730_v61  ;;  %2552 = vst [vmem:[%s3961_s13 + $0x1c0] sm:$0xff] %v2421_v7  ;;  %v2165_v21 = vpop.f32.mrf.mxu1  ;;  %v1641_v63 = vadd.f32 %v4199_v11, %v1589_v19  ;;  %3230 = vrsqrt.f32 %v1011_v31  ;;  %vm1335_vm12 = vweird.f32 %v1011_v31 }
 0x375   : > { %v1324_v32 = vmul.f32 %v3229_v40, %v1323_v1  ;;  %2553 = vst [vmem:[%s3961_s13 + $0x1c8] sm:$0xff] %v2165_v21 }
 0x376   : > { %v826_v60 = vmul.f32 %v4496_v20, %v4496_v20 }
 0x377   : > { %v1328_v13 = vsel %vm1327_vm10, %v3229_v40, %v1324_v32  ;;  %v2961_v58 = vld [vmem:[#allocation2 + $0x50] sm:$0xff] }
 0x378   : > { %v1538_v59 = vmul.f32 %v1328_v13, %v4302_v5  ;;  %676 = vadd.xlane.f32.xlu0 %v4500_v51  ;;  %911 = vadd.xlane.f32.xlu1 %v826_v60  ;;  %v530_v5 = vpop.f32.mrf.mxu0 }
 0x379   : > { %v667_v23 = vpop.xlane.xlu0 %666  ;;  %2182 = vmatmul.bf16.gmra.mxu1 %v2961_v58  ;;  %2311 = vmatmul.bf16.gmra.mxu2 %v2961_v58  ;;  %v531_v30 = vadd.f32 %v530_v5, %v4246_v25 }
 0x37a   : > { %v1590_v2 = vmul.f32 %v4184_v35, %v1538_v59  ;;  %v731_v17 = vmul.f32 %v3457_v0, %v667_v23  ;;  %2440 = vmatmul.bf16.gmra.mxu3 %v2961_v58  ;;  %v2294_v44 = vpop.f32.mrf.mxu2  ;;  %v3231_v39 = vpop.eup %3230 }
 0x37b   : > { %2554 = vst [vmem:[%s3961_s13 + $0x1d0] sm:$0xff] %v2294_v44  ;;  %v2423_v34 = vpop.f32.mrf.mxu3  ;;  %v4530_v24 = vadd.f32 %v4399_v14, %v531_v30  ;;  %v1330_v43 = vmul.f32 %v3231_v39, %v1011_v31  ;;  %vm1336_vm11 = vweird.f32 %v3231_v39 }
 0x37c   : > { %v1642_v29 = vadd.f32 %v4199_v11, %v1590_v2  ;;  %v4516_v55 = vsub.f32 %v4346_v18, %v731_v17  ;;  %2555 = vst [vmem:[%s3961_s13 + $0x1d8] sm:$0xff] %v2423_v34  ;;  %v2168_v46 = vpop.f32.mrf.mxu1  ;;  %vm1337_vm13 = vmor %vm1335_vm12, %vm1336_vm11 }
 0x37d   : > { %2556 = vst [vmem:[%s3961_s13 + $0x1e0] sm:$0xff] %v2168_v46 }
 0x37e   : > { %v3069_v52 = vpack.c.bf16 %v1642_v29, %v1641_v63  ;;  %v827_v38 = vmul.f32 %v4516_v55, %v4516_v55 }
 0x380   : > { %3129 = vst [vmem:[#allocation2 + $0x70] sm:$0xff] %v3069_v52   ;;  %678 = vadd.xlane.f32.xlu0 %v4520_v15  ;;  %913 = vadd.xlane.f32.xlu1 %v827_v38  ;;  %v533_v22 = vpop.f32.mrf.mxu0 }
 0x381   : > { %v534_v6 = vadd.f32 %v533_v22, %v4295_v49  ;;  %v1331_v49 = vmul.f32 %v3231_v39, %v1330_v43 }
 0x382   : > { %v2297_v18 = vpop.f32.mrf.mxu2 }
 0x383   : > { %2557 = vst [vmem:[%s3961_s13 + $0x1e8] sm:$0xff] %v2297_v18  ;;  %v2426_v50 = vpop.f32.mrf.mxu3  ;;  %v4538_v3 = vadd.f32 %v4399_v14, %v534_v6  ;;  %v1332_v61 = vmul.f32 0.5, %v1331_v49 }
 0x384   : > { %2558 = vst [vmem:[%s3961_s13 + $0x1f0] sm:$0xff] %v2426_v50  ;;  %v2170_v40 = vpop.f32.mrf.mxu1 }
 0x385   : > { %2559 = vst [vmem:[%s3961_s13 + $0x1f8] sm:$0xff] %v2170_v40  ;;  %v1333_v36 = vsub.f32 1.5, %v1332_v61  ;;  %v4558_v40 = vld [vmem:[%s4803_s3] ss:$0 sm:$0xff] }
 0x387   : > { %v2962_v41 = vld [vmem:[#allocation2 + $0x70] sm:$0xff]  ;;  %v1334_v32 = vmul.f32 %v3231_v39, %v1333_v36 }
 0x388   : > { %680 = vadd.xlane.f32.xlu1 %v4530_v24 }
 0x389   : > { %2187 = vmatmul.bf16.gmra.mxu1 %v2962_v41  ;;  %2316 = vmatmul.bf16.gmra.mxu2 %v2962_v41  ;;  %v1338_v13 = vsel %vm1337_vm13, %v3231_v39, %v1334_v32 }
 0x38a   : > { %2445 = vmatmul.bf16.gmra.mxu3 %v2962_v41  ;;  %v2299_v25 = vpop.f32.mrf.mxu2  ;;  %v1539_v44 = vmul.f32 %v1338_v13, %v4324_v16 }
 0x38b   : > { %2560 = vst [vmem:[%s3961_s13 + $0x200] sm:$0xff] %v2299_v25  ;;  %v2428_v62 = vpop.f32.mrf.mxu3 }
 0x38c   : > { %2561 = vst [vmem:[%s3961_s13 + $0x208] sm:$0xff] %v2428_v62  ;;  %v1591_v30 = vmul.f32 %v4184_v35, %v1539_v44 }
 0x390   : > { %682 = vadd.xlane.f32.xlu1 %v4538_v3 }
 0x3bb   : > { %v900_v42 = vpop.xlane.xlu1 %899 }
 0x3bc   : > { %v964_v48 = vmul.f32 %v900_v42, %v3457_v0 }
 0x3be   : > { %v1012_v37 = vadd.f32 1e-05, %v964_v48 }
 0x3c0   : > { %3232 = vrsqrt.f32 %v1012_v37  ;;  %vm1345_vm15 = vweird.f32 %v1012_v37 }
 0x3c3   : > { %v902_v1 = vpop.xlane.xlu1 %901 }
 0x3c4   : > { %v965_v7 = vmul.f32 %v902_v1, %v3457_v0 }
 0x3c6   : > { %v3233_v45 = vpop.eup %3232  ;;  %v1013_v21 = vadd.f32 1e-05, %v965_v7 }
 0x3c7   : > { %v1340_v8 = vmul.f32 %v3233_v45, %v1012_v37  ;;  %vm1346_vm14 = vweird.f32 %v3233_v45 }
 0x3c8   : > { %3234 = vrsqrt.f32 %v1013_v21  ;;  %vm1347_vm0 = vmor %vm1345_vm15, %vm1346_vm14  ;;  %vm1355_vm2 = vweird.f32 %v1013_v21 }
 0x3c9   : > { %v1341_v60 = vmul.f32 %v3233_v45, %v1340_v8 }
 0x3cb   : > { %v1342_v58 = vmul.f32 0.5, %v1341_v60  ;;  %v904_v19 = vpop.xlane.xlu2 %903  ;;  %v669_v59 = vpop.xlane.xlu1 %668 }
 0x3cc   : > { %v966_v53 = vmul.f32 %v904_v19, %v3457_v0  ;;  %v732_v23 = vmul.f32 %v3457_v0, %v669_v59 }
 0x3cd   : > { %v1343_v2 = vsub.f32 1.5, %v1342_v58 }
 0x3ce   : > { %v3235_v17 = vpop.eup %3234  ;;  %v1014_v34 = vadd.f32 1e-05, %v966_v53  ;;  %v4549_v5 = vsub.f32 %v4402_v26, %v732_v23 }
 0x3cf   : > { %v1344_v63 = vmul.f32 %v3233_v45, %v1343_v2  ;;  %v1350_v29 = vmul.f32 %v3235_v17, %v1013_v21  ;;  %vm1356_vm1 = vweird.f32 %v3235_v17 }
 0x3d0   : > { %3236 = vrsqrt.f32 %v1014_v34  ;;  %v828_v46 = vmul.f32 %v4549_v5, %v4549_v5  ;;  %vm1357_vm3 = vmor %vm1355_vm2, %vm1356_vm1  ;;  %vm1365_vm5 = vweird.f32 %v1014_v34 }
 0x3d1   : > { %v1348_v52 = vsel %vm1347_vm0, %v3233_v45, %v1344_v63  ;;  %v1351_v38 = vmul.f32 %v3235_v17, %v1350_v29 }
 0x3d2   : > { %v1540_v18 = vmul.f32 %v1348_v52, %v4357_v9  ;;  %915 = vadd.xlane.f32.xlu2 %v828_v46  ;;  %v1643_v9 = vadd.f32 %v4199_v11, %v1591_v30 }
 0x3d3   : > { %v1352_v16 = vmul.f32 0.5, %v1351_v38  ;;  %v906_v50 = vpop.xlane.xlu2 %905  ;;  %v671_v26 = vpop.xlane.xlu1 %670 }
 0x3d4   : > { %v1592_v22 = vmul.f32 %v4558_v40, %v1540_v18  ;;  %v967_v41 = vmul.f32 %v906_v50, %v3457_v0  ;;  %v733_v6 = vmul.f32 %v3457_v0, %v671_v26  ;;  %v4607_v26 = vld [vmem:[%s4804_s4] ss:$0 sm:$0xff] }
 0x3d5   : > { %v1353_v25 = vsub.f32 1.5, %v1352_v16 }
 0x3d6   : > { %v3237_v35 = vpop.eup %3236  ;;  %v1644_v62 = vadd.f32 %v4199_v11, %v1592_v22  ;;  %v4565_v4 = vadd.f32 1e-05, %v967_v41  ;;  %v4568_v31 = vsub.f32 %v4414_v47, %v733_v6  ;;  %v2173_v39 = vpop.f32.mrf.mxu1 }
 0x3d7   : > { %v1354_v43 = vmul.f32 %v3235_v17, %v1353_v25  ;;  %v1360_v49 = vmul.f32 %v3237_v35, %v1014_v34  ;;  %2562 = vst [vmem:[%s3961_s13 + $0x210] sm:$0xff] %v2173_v39  ;;  %v535_v11 = vpop.f32.mrf.mxu0  ;;  %vm1366_vm4 = vweird.f32 %v3237_v35 }
 0x3d8   : > { %v3074_v42 = vpack.c.bf16 %v1644_v62, %v1643_v9  ;;  %3238 = vrsqrt.f32 %v4565_v4  ;;  %v829_v48 = vmul.f32 %v4568_v31, %v4568_v31  ;;  %v536_v7 = vadd.f32 %v535_v11, %v4298_v56  ;;  %vm1367_vm6 = vmor %vm1365_vm5, %vm1366_vm4 }
 0x3d9   : > { %v1361_v37 = vmul.f32 %v3237_v35, %v1360_v49  ;;  %v1358_v47 = vsel %vm1357_vm3, %v3235_v17, %v1354_v43  ;;  %vm1375_vm8 = vweird.f32 %v4565_v4 }
 0x3da   : > { %3130 = vst [vmem:[#allocation2 + $0xa0] sm:$0xff] %v3074_v42   ;;  %917 = vadd.xlane.f32.xlu2 %v829_v48  ;;  %v1541_v58 = vmul.f32 %v1358_v47, %v4371_v33  ;;  %v4594_v33 = vadd.f32 %v4399_v14, %v536_v7 }
 0x3db   : > { %v1362_v61 = vmul.f32 0.5, %v1361_v37  ;;  %v673_v36 = vpop.xlane.xlu2 %672  ;;  %v908_v1 = vpop.xlane.xlu0 %907 }
 0x3dc   : > { %v734_v45 = vmul.f32 %v3457_v0, %v673_v36  ;;  %v968_v32 = vmul.f32 %v908_v1, %v3457_v0  ;;  %v2302_v8 = vpop.f32.mrf.mxu2  ;;  %v1593_v34 = vmul.f32 %v4558_v40, %v1541_v58 }
 0x3dd   : > { %v1363_v21 = vsub.f32 1.5, %v1362_v61  ;;  %2563 = vst [vmem:[%s3961_s13 + $0x218] sm:$0xff] %v2302_v8  ;;  %v2431_v60 = vpop.f32.mrf.mxu3 }
 0x3de   : > { %v4578_v13 = vpop.eup %3238  ;;  %v4582_v19 = vsub.f32 %v4461_v12, %v734_v45  ;;  %v4584_v59 = vadd.f32 1e-05, %v968_v32  ;;  %2564 = vst [vmem:[%s3961_s13 + $0x220] sm:$0xff] %v2431_v60  ;;  %v2175_v56 = vpop.f32.mrf.mxu1  ;;  %v1645_v22 = vadd.f32 %v4607_v26, %v1593_v34 }
 0x3df   : > { %v1364_v53 = vmul.f32 %v3237_v35, %v1363_v21  ;;  %v1370_v23 = vmul.f32 %v4578_v13, %v4565_v4  ;;  %2565 = vst [vmem:[%s3961_s13 + $0x228] sm:$0xff] %v2175_v56  ;;  %vm1376_vm7 = vweird.f32 %v4578_v13 }
 0x3e0   : > { %3240 = vrsqrt.f32 %v4584_v59  ;;  %v830_v2 = vmul.f32 %v4582_v19, %v4582_v19  ;;  %vm1377_vm9 = vmor %vm1375_vm8, %vm1376_vm7  ;;  %vm1385_vm11 = vweird.f32 %v4584_v59 }
 0x3e1   : > { %v1368_v12 = vsel %vm1367_vm6, %v3237_v35, %v1364_v53  ;;  %v1371_v17 = vmul.f32 %v4578_v13, %v1370_v23  ;;  %v2963_v44 = vld [vmem:[#allocation2 + $0xa0] sm:$0xff] }
 0x3e2   : > { %v1542_v63 = vmul.f32 %v1368_v12, %v4387_v28  ;;  %919 = vadd.xlane.f32.xlu0 %v830_v2  ;;  %684 = vadd.xlane.f32.xlu2 %v4594_v33 }
 0x3e3   : > { %v1372_v29 = vmul.f32 0.5, %v1371_v17  ;;  %v675_v46 = vpop.xlane.xlu2 %674  ;;  %v910_v52 = vpop.xlane.xlu0 %909  ;;  %2192 = vmatmul.bf16.gmra.mxu1 %v2963_v44  ;;  %2321 = vmatmul.bf16.gmra.mxu2 %v2963_v44 }
 0x3e4   : > { %v1594_v14 = vmul.f32 %v4558_v40, %v1542_v63  ;;  %v735_v38 = vmul.f32 %v3457_v0, %v675_v46  ;;  %v969_v30 = vmul.f32 %v910_v52, %v3457_v0  ;;  %2450 = vmatmul.bf16.gmra.mxu3 %v2963_v44  ;;  %v2304_v18 = vpop.f32.mrf.mxu2 }
 0x3e5   : > { %v1373_v16 = vsub.f32 1.5, %v1372_v29  ;;  %2566 = vst [vmem:[%s3961_s13 + $0x230] sm:$0xff] %v2304_v18  ;;  %v2433_v28 = vpop.f32.mrf.mxu3 }
 0x3e6   : > { %v3241_v50 = vpop.eup %3240  ;;  %v1646_v41 = vadd.f32 %v4607_v26, %v1594_v14  ;;  %v4612_v6 = vsub.f32 %v4480_v10, %v735_v38  ;;  %v4614_v25 = vadd.f32 1e-05, %v969_v30  ;;  %2567 = vst [vmem:[%s3961_s13 + $0x238] sm:$0xff] %v2433_v28  ;;  %v2178_v35 = vpop.f32.mrf.mxu1 }
 0x3e7   : > { %v1374_v9 = vmul.f32 %v4578_v13, %v1373_v16  ;;  %v1380_v62 = vmul.f32 %v3241_v50, %v4584_v59  ;;  %2568 = vst [vmem:[%s3961_s13 + $0x240] sm:$0xff] %v2178_v35  ;;  %vm1386_vm10 = vweird.f32 %v3241_v50 }
 0x3e8   : > { %v3079_v39 = vpack.c.bf16 %v1646_v41, %v1645_v22  ;;  %3242 = vrsqrt.f32 %v4614_v25  ;;  %v831_v43 = vmul.f32 %v4612_v6, %v4612_v6  ;;  %vm1387_vm12 = vmor %vm1385_vm11, %vm1386_vm10  ;;  %vm1395_vm14 = vweird.f32 %v4614_v25 }
 0x3e9   : > { %v1381_v10 = vmul.f32 %v3241_v50, %v1380_v62  ;;  %v1378_v49 = vsel %vm1377_vm9, %v4578_v13, %v1374_v9 }
 0x3ea   : > { %3131 = vst [vmem:[#allocation2 + $0xa8] sm:$0xff] %v3079_v39   ;;  %921 = vadd.xlane.f32.xlu0 %v831_v43  ;;  %v1543_v7 = vmul.f32 %v1378_v49, %v4421_v57 }
 0x3eb   : > { %v1382_v42 = vmul.f32 0.5, %v1381_v10  ;;  %v912_v48 = vpop.xlane.xlu1 %911  ;;  %v677_v37 = vpop.xlane.xlu0 %676 }
 0x3ec   : > { %v970_v11 = vmul.f32 %v912_v48, %v3457_v0  ;;  %v736_v47 = vmul.f32 %v3457_v0, %v677_v37  ;;  %v2307_v61 = vpop.f32.mrf.mxu2 }
 0x3ed   : > { %v1383_v36 = vsub.f32 1.5, %v1382_v42  ;;  %2569 = vst [vmem:[%s3961_s13 + $0x248] sm:$0xff] %v2307_v61  ;;  %v2436_v4 = vpop.f32.mrf.mxu3 }
 0x3ee   : > { %v3243_v1 = vpop.eup %3242  ;;  %v1018_v45 = vadd.f32 1e-05, %v970_v11  ;;  %v4631_v32 = vsub.f32 %v4500_v51, %v736_v47  ;;  %2570 = vst [vmem:[%s3961_s13 + $0x250] sm:$0xff] %v2436_v4  ;;  %v2180_v8 = vpop.f32.mrf.mxu1  ;;  %v1595_v51 = vmul.f32 %v4558_v40, %v1543_v7 }
 0x3ef   : > { %v1384_v21 = vmul.f32 %v3241_v50, %v1383_v36  ;;  %v1390_v60 = vmul.f32 %v3243_v1, %v4614_v25  ;;  %2571 = vst [vmem:[%s3961_s13 + $0x258] sm:$0xff] %v2180_v8  ;;  %vm1396_vm13 = vweird.f32 %v3243_v1 }
 0x3f0   : > { %3244 = vrsqrt.f32 %v1018_v45  ;;  %v832_v13 = vmul.f32 %v4631_v32, %v4631_v32  ;;  %vm1397_vm15 = vmor %vm1395_vm14, %vm1396_vm13  ;;  %vm1405_vm1 = vweird.f32 %v1018_v45 }
 0x3f1   : > { %v1388_v58 = vsel %vm1387_vm12, %v3241_v50, %v1384_v21  ;;  %v1391_v57 = vmul.f32 %v3243_v1, %v1390_v60  ;;  %v2964_v56 = vld [vmem:[#allocation2 + $0xa8] sm:$0xff] }
 0x3f2   : > { %v1544_v53 = vmul.f32 %v1388_v58, %v4448_v54  ;;  %923 = vadd.xlane.f32.xlu1 %v832_v13  ;;  %v1647_v54 = vadd.f32 %v4607_v26, %v1595_v51 }
 0x3f3   : > { %v1392_v23 = vmul.f32 0.5, %v1391_v57  ;;  %v4641_v59 = vpop.xlane.xlu1 %913  ;;  %v679_v2 = vpop.xlane.xlu0 %678  ;;  %2197 = vmatmul.bf16.gmra.mxu1 %v2964_v56  ;;  %2326 = vmatmul.bf16.gmra.mxu2 %v2964_v56 }
 0x3f4   : > { %v1596_v12 = vmul.f32 %v4558_v40, %v1544_v53  ;;  %v737_v17 = vmul.f32 %v3457_v0, %v679_v2  ;;  %2455 = vmatmul.bf16.gmra.mxu3 %v2964_v56  ;;  %v2309_v44 = vpop.f32.mrf.mxu2  ;;  %v971_v56 = vmul.f32 %v4641_v59, %v3457_v0 }
 0x3f5   : > { %v1393_v34 = vsub.f32 1.5, %v1392_v23  ;;  %2572 = vst [vmem:[%s3961_s13 + $0x260] sm:$0xff] %v2309_v44  ;;  %v2438_v63 = vpop.f32.mrf.mxu3 }
 0x3f6   : > { %v3245_v29 = vpop.eup %3244  ;;  %v1648_v46 = vadd.f32 %v4607_v26, %v1596_v12  ;;  %v4649_v52 = vsub.f32 %v4520_v15, %v737_v17  ;;  %2573 = vst [vmem:[%s3961_s13 + $0x268] sm:$0xff] %v2438_v63  ;;  %v2183_v14 = vpop.f32.mrf.mxu1  ;;  %v1019_v51 = vadd.f32 1e-05, %v971_v56 }
 0x3f7   : > { %v1394_v38 = vmul.f32 %v3243_v1, %v1393_v34  ;;  %v1400_v30 = vmul.f32 %v3245_v29, %v1018_v45  ;;  %2574 = vst [vmem:[%s3961_s13 + $0x270] sm:$0xff] %v2183_v14  ;;  %vm1406_vm0 = vweird.f32 %v3245_v29 }
 0x3f8   : > { %v3084_v18 = vpack.c.bf16 %v1648_v46, %v1647_v54  ;;  %v833_v16 = vmul.f32 %v4649_v52, %v4649_v52  ;;  %vm1407_vm2 = vmor %vm1405_vm1, %vm1406_vm0  ;;  %3246 = vrsqrt.f32 %v1019_v51  ;;  %vm1415_vm4 = vweird.f32 %v1019_v51 }
 0x3f9   : > { %v1401_v28 = vmul.f32 %v3245_v29, %v1400_v30  ;;  %v1398_v15 = vsel %vm1397_vm15, %v3243_v1, %v1394_v38 }
 0x3fa   : > { %3132 = vst [vmem:[#allocation2 + $0x68] sm:$0xff] %v3084_v18   ;;  %925 = vadd.xlane.f32.xlu2 %v833_v16  ;;  %v1545_v39 = vmul.f32 %v1398_v15, %v4476_v27 }
 0x3fb   : > { %v1402_v50 = vmul.f32 0.5, %v1401_v28  ;;  %v681_v22 = vpop.xlane.xlu1 %680 }
 0x3fc   : > { %v738_v41 = vmul.f32 %v3457_v0, %v681_v22  ;;  %v2312_v35 = vpop.f32.mrf.mxu2  ;;  %v1597_v37 = vmul.f32 %v4558_v40, %v1545_v39 }
 0x3fd   : > { %v1403_v9 = vsub.f32 1.5, %v1402_v50  ;;  %2575 = vst [vmem:[%s3961_s13 + $0x278] sm:$0xff] %v2312_v35  ;;  %v2441_v62 = vpop.f32.mrf.mxu3 }
 0x3fe   : > { %v4660_v25 = vsub.f32 %v4530_v24, %v738_v41  ;;  %2576 = vst [vmem:[%s3961_s13 + $0x280] sm:$0xff] %v2441_v62  ;;  %v2185_v43 = vpop.f32.mrf.mxu1  ;;  %v1649_v4 = vadd.f32 %v4607_v26, %v1597_v37  ;;  %v3247_v53 = vpop.eup %3246 }
 0x3ff   : > { %v1404_v10 = vmul.f32 %v3245_v29, %v1403_v9  ;;  %2577 = vst [vmem:[%s3961_s13 + $0x288] sm:$0xff] %v2185_v43  ;;  %v1410_v23 = vmul.f32 %v3247_v53, %v1019_v51  ;;  %vm1416_vm3 = vweird.f32 %v3247_v53 }
 0x400   : > { %v834_v49 = vmul.f32 %v4660_v25, %v4660_v25  ;;  %vm1417_vm5 = vmor %vm1415_vm4, %vm1416_vm3 }
 0x401   : > { %v1408_v42 = vsel %vm1407_vm2, %v3245_v29, %v1404_v10  ;;  %v2965_v48 = vld [vmem:[#allocation2 + $0x68] sm:$0xff]  ;;  %v1411_v2 = vmul.f32 %v3247_v53, %v1410_v23 }
 0x402   : > { %v1546_v27 = vmul.f32 %v1408_v42, %v4496_v20  ;;  %927 = vadd.xlane.f32.xlu0 %v834_v49 }
 0x403   : > { %v683_v24 = vpop.xlane.xlu1 %682  ;;  %2202 = vmatmul.bf16.gmra.mxu1 %v2965_v48  ;;  %2331 = vmatmul.bf16.gmra.mxu2 %v2965_v48  ;;  %v1412_v34 = vmul.f32 0.5, %v1411_v2 }
 0x404   : > { %v1598_v11 = vmul.f32 %v4558_v40, %v1546_v27  ;;  %v739_v47 = vmul.f32 %v3457_v0, %v683_v24  ;;  %2460 = vmatmul.bf16.gmra.mxu3 %v2965_v48  ;;  %v2314_v61 = vpop.f32.mrf.mxu2 }
 0x405   : > { %2578 = vst [vmem:[%s3961_s13 + $0x290] sm:$0xff] %v2314_v61  ;;  %v2443_v36 = vpop.f32.mrf.mxu3  ;;  %v1413_v63 = vsub.f32 1.5, %v1412_v34 }
 0x406   : > { %v1650_v20 = vadd.f32 %v4607_v26, %v1598_v11  ;;  %v4674_v1 = vsub.f32 %v4538_v3, %v739_v47  ;;  %2579 = vst [vmem:[%s3961_s13 + $0x298] sm:$0xff] %v2443_v36  ;;  %v2188_v7 = vpop.f32.mrf.mxu1 }
 0x407   : > { %2580 = vst [vmem:[%s3961_s13 + $0x2a0] sm:$0xff] %v2188_v7  ;;  %v1414_v38 = vmul.f32 %v3247_v53, %v1413_v63 }
 0x408   : > { %v3089_v45 = vpack.c.bf16 %v1650_v20, %v1649_v4  ;;  %v835_v8 = vmul.f32 %v4674_v1, %v4674_v1 }
 0x409   : > { %v1418_v18 = vsel %vm1417_vm5, %v3247_v53, %v1414_v38 }
 0x40a   : > { %3133 = vst [vmem:[#allocation2 + $0x30] sm:$0xff] %v3089_v45   ;;  %929 = vadd.xlane.f32.xlu1 %v835_v8  ;;  %v1547_v9 = vmul.f32 %v1418_v18, %v4516_v55 }
 0x40c   : > { %v2317_v21 = vpop.f32.mrf.mxu2  ;;  %v1599_v37 = vmul.f32 %v4558_v40, %v1547_v9 }
 0x40d   : > { %2581 = vst [vmem:[%s3961_s13 + $0x2a8] sm:$0xff] %v2317_v21  ;;  %v2446_v60 = vpop.f32.mrf.mxu3 }
 0x40e   : > { %2582 = vst [vmem:[%s3961_s13 + $0x2b0] sm:$0xff] %v2446_v60  ;;  %v2190_v13 = vpop.f32.mrf.mxu1  ;;  %v1651_v36 = vadd.f32 %v4607_v26, %v1599_v37 }
 0x40f   : > { %2583 = vst [vmem:[%s3961_s13 + $0x2b8] sm:$0xff] %v2190_v13 }
 0x411   : > { %v2966_v58 = vld [vmem:[#allocation2 + $0x30] sm:$0xff] }
 0x413   : > { %2207 = vmatmul.bf16.gmra.mxu1 %v2966_v58  ;;  %2336 = vmatmul.bf16.gmra.mxu2 %v2966_v58 }
 0x414   : > { %2465 = vmatmul.bf16.gmra.mxu3 %v2966_v58  ;;  %v2319_v3 = vpop.f32.mrf.mxu2 }
 0x415   : > { %2584 = vst [vmem:[%s3961_s13 + $0x2c0] sm:$0xff] %v2319_v3  ;;  %v2448_v57 = vpop.f32.mrf.mxu3 }
 0x416   : > { %2585 = vst [vmem:[%s3961_s13 + $0x2c8] sm:$0xff] %v2448_v57 }
 0x445   : > { %v916_v12 = vpop.xlane.xlu2 %915 }
 0x446   : > { %v972_v17 = vmul.f32 %v916_v12, %v3457_v0 }
 0x448   : > { %v1020_v44 = vadd.f32 1e-05, %v972_v17 }
 0x44a   : > { %3248 = vrsqrt.f32 %v1020_v44  ;;  %vm1425_vm7 = vweird.f32 %v1020_v44 }
 0x44d   : > { %v918_v29 = vpop.xlane.xlu2 %917 }
 0x44e   : > { %v973_v54 = vmul.f32 %v918_v29, %v3457_v0 }
 0x450   : > { %v3249_v46 = vpop.eup %3248  ;;  %v1021_v14 = vadd.f32 1e-05, %v973_v54 }
 0x451   : > { %v1420_v59 = vmul.f32 %v3249_v46, %v1020_v44  ;;  %vm1426_vm6 = vweird.f32 %v3249_v46 }
 0x452   : > { %3250 = vrsqrt.f32 %v1021_v14  ;;  %vm1427_vm8 = vmor %vm1425_vm7, %vm1426_vm6  ;;  %vm1435_vm10 = vweird.f32 %v1021_v14 }
 0x453   : > { %v1421_v30 = vmul.f32 %v3249_v46, %v1420_v59 }
 0x455   : > { %v1422_v16 = vmul.f32 0.5, %v1421_v30  ;;  %v685_v28 = vpop.xlane.xlu2 %684  ;;  %v920_v15 = vpop.xlane.xlu0 %919 }
 0x456   : > { %v740_v50 = vmul.f32 %v3457_v0, %v685_v28  ;;  %v974_v22 = vmul.f32 %v920_v15, %v3457_v0 }
 0x457   : > { %v1423_v41 = vsub.f32 1.5, %v1422_v16 }
 0x458   : > { %v3251_v35 = vpop.eup %3250  ;;  %v4693_v62 = vsub.f32 %v4594_v33, %v740_v50  ;;  %v1022_v39 = vadd.f32 1e-05, %v974_v22 }
 0x459   : > { %v1424_v43 = vmul.f32 %v3249_v46, %v1423_v41  ;;  %v1430_v10 = vmul.f32 %v3251_v35, %v1021_v14  ;;  %vm1436_vm9 = vweird.f32 %v3251_v35 }
 0x45a   : > { %3252 = vrsqrt.f32 %v1022_v39  ;;  %v836_v49 = vmul.f32 %v4693_v62, %v4693_v62  ;;  %vm1437_vm11 = vmor %vm1435_vm10, %vm1436_vm9  ;;  %vm1445_vm13 = vweird.f32 %v1022_v39 }
 0x45b   : > { %v1428_v42 = vsel %vm1427_vm8, %v3249_v46, %v1424_v43  ;;  %v1431_v48 = vmul.f32 %v3251_v35, %v1430_v10 }
 0x45c   : > { %v1548_v27 = vmul.f32 %v1428_v42, %v4549_v5  ;;  %931 = vadd.xlane.f32.xlu2 %v836_v49 }
 0x45d   : > { %v1432_v55 = vmul.f32 0.5, %v1431_v48  ;;  %v922_v33 = vpop.xlane.xlu0 %921 }
 0x45e   : > { %v1600_v24 = vmul.f32 %v4558_v40, %v1548_v27  ;;  %v975_v11 = vmul.f32 %v922_v33, %v3457_v0 }
 0x45f   : > { %v1433_v47 = vsub.f32 1.5, %v1432_v55 }
 0x460   : > { %v3253_v61 = vpop.eup %3252  ;;  %v1652_v4 = vadd.f32 %v4607_v26, %v1600_v24  ;;  %v4703_v20 = vadd.f32 1e-05, %v975_v11  ;;  %v2193_v7 = vpop.f32.mrf.mxu1 }
 0x461   : > { %v1434_v45 = vmul.f32 %v3251_v35, %v1433_v47  ;;  %v1440_v5 = vmul.f32 %v3253_v61, %v1022_v39  ;;  %2586 = vst [vmem:[%s3961_s13 + $0x2d0] sm:$0xff] %v2193_v7  ;;  %vm1446_vm12 = vweird.f32 %v3253_v61 }
 0x462   : > { %v3094_v8 = vpack.c.bf16 %v1652_v4, %v1651_v36  ;;  %3254 = vrsqrt.f32 %v4703_v20  ;;  %vm1447_vm14 = vmor %vm1445_vm13, %vm1446_vm12  ;;  %vm1455_vm0 = vweird.f32 %v4703_v20 }
 0x463   : > { %v1441_v21 = vmul.f32 %v3253_v61, %v1440_v5  ;;  %v1438_v60 = vsel %vm1437_vm11, %v3251_v35, %v1434_v45 }
 0x464   : > { %3134 = vst [vmem:[#allocation2 + $0x58] sm:$0xff] %v3094_v8   ;;  %v1549_v23 = vmul.f32 %v1438_v60, %v4568_v31 }
 0x465   : > { %v1442_v13 = vmul.f32 0.5, %v1441_v21  ;;  %v924_v58 = vpop.xlane.xlu1 %923 }
 0x466   : > { %v976_v3 = vmul.f32 %v924_v58, %v3457_v0  ;;  %v2322_v57 = vpop.f32.mrf.mxu2  ;;  %v1601_v54 = vmul.f32 %v4558_v40, %v1549_v23 }
 0x467   : > { %v1443_v56 = vsub.f32 1.5, %v1442_v13  ;;  %2587 = vst [vmem:[%s3961_s13 + $0x2d8] sm:$0xff] %v2322_v57  ;;  %v2451_v51 = vpop.f32.mrf.mxu3 }
 0x468   : > { %v3255_v53 = vpop.eup %3254  ;;  %v1024_v2 = vadd.f32 1e-05, %v976_v3  ;;  %2588 = vst [vmem:[%s3961_s13 + $0x2e0] sm:$0xff] %v2451_v51  ;;  %v2195_v12 = vpop.f32.mrf.mxu1  ;;  %v1653_v15 = vadd.f32 %v4607_v26, %v1601_v54 }
 0x469   : > { %v1444_v17 = vmul.f32 %v3253_v61, %v1443_v56  ;;  %v1450_v44 = vmul.f32 %v3255_v53, %v4703_v20  ;;  %2589 = vst [vmem:[%s3961_s13 + $0x2e8] sm:$0xff] %v2195_v12  ;;  %vm1456_vm15 = vweird.f32 %v3255_v53 }
 0x46a   : > { %3256 = vrsqrt.f32 %v1024_v2  ;;  %vm1457_vm1 = vmor %vm1455_vm0, %vm1456_vm15  ;;  %vm1465_vm3 = vweird.f32 %v1024_v2 }
 0x46b   : > { %v1448_v34 = vsel %vm1447_vm14, %v3253_v61, %v1444_v17  ;;  %v1451_v63 = vmul.f32 %v3255_v53, %v1450_v44  ;;  %v2967_v29 = vld [vmem:[#allocation2 + $0x58] sm:$0xff] }
 0x46c   : > { %v1550_v46 = vmul.f32 %v1448_v34, %v4582_v19  ;;  %2212 = vmatmul.bf16.gmra.mxu1 %v2967_v29  ;;  %2341 = vmatmul.bf16.gmra.mxu2 %v2967_v29 }
 0x46d   : > { %v1452_v31 = vmul.f32 0.5, %v1451_v63  ;;  %v926_v14 = vpop.xlane.xlu2 %925  ;;  %2470 = vmatmul.bf16.gmra.mxu3 %v2967_v29 }
 0x46e   : > { %v1602_v38 = vmul.f32 %v4558_v40, %v1550_v46  ;;  %v977_v59 = vmul.f32 %v926_v14, %v3457_v0  ;;  %v2324_v30 = vpop.f32.mrf.mxu2 }
 0x46f   : > { %v1453_v18 = vsub.f32 1.5, %v1452_v31  ;;  %2590 = vst [vmem:[%s3961_s13 + $0x2f0] sm:$0xff] %v2324_v30  ;;  %v2453_v16 = vpop.f32.mrf.mxu3 }
 0x470   : > { %v3257_v28 = vpop.eup %3256  ;;  %v1654_v19 = vadd.f32 %v4607_v26, %v1602_v38  ;;  %v1025_v50 = vadd.f32 1e-05, %v977_v59  ;;  %2591 = vst [vmem:[%s3961_s13 + $0x2f8] sm:$0xff] %v2453_v16  ;;  %v2198_v22 = vpop.f32.mrf.mxu1 }
 0x471   : > { %v1454_v41 = vmul.f32 %v3255_v53, %v1453_v18  ;;  %v1460_v35 = vmul.f32 %v3257_v28, %v1024_v2  ;;  %2592 = vst [vmem:[%s3961_s13 + $0x300] sm:$0xff] %v2198_v22  ;;  %vm1466_vm2 = vweird.f32 %v3257_v28 }
 0x472   : > { %v3099_v9 = vpack.c.bf16 %v1654_v19, %v1653_v15  ;;  %3258 = vrsqrt.f32 %v1025_v50  ;;  %vm1467_vm4 = vmor %vm1465_vm3, %vm1466_vm2  ;;  %vm1475_vm6 = vweird.f32 %v1025_v50 }
 0x473   : > { %v1461_v39 = vmul.f32 %v3257_v28, %v1460_v35  ;;  %v1458_v43 = vsel %vm1457_vm1, %v3255_v53, %v1454_v41 }
 0x474   : > { %3135 = vst [vmem:[#allocation2 + $0x80] sm:$0xff] %v3099_v9   ;;  %v1551_v33 = vmul.f32 %v1458_v43, %v4612_v6 }
 0x475   : > { %v1462_v10 = vmul.f32 0.5, %v1461_v39  ;;  %v928_v49 = vpop.xlane.xlu0 %927 }
 0x476   : > { %v978_v42 = vmul.f32 %v928_v49, %v3457_v0  ;;  %v2327_v48 = vpop.f32.mrf.mxu2  ;;  %v1603_v7 = vmul.f32 %v4558_v40, %v1551_v33 }
 0x477   : > { %v1463_v37 = vsub.f32 1.5, %v1462_v10  ;;  %2593 = vst [vmem:[%s3961_s13 + $0x308] sm:$0xff] %v2327_v48  ;;  %v2456_v27 = vpop.f32.mrf.mxu3 }
 0x478   : > { %v3259_v55 = vpop.eup %3258  ;;  %v1026_v24 = vadd.f32 1e-05, %v978_v42  ;;  %2594 = vst [vmem:[%s3961_s13 + $0x310] sm:$0xff] %v2456_v27  ;;  %v2200_v11 = vpop.f32.mrf.mxu1  ;;  %v1655_v58 = vadd.f32 %v4607_v26, %v1603_v7 }
 0x479   : > { %v1464_v47 = vmul.f32 %v3257_v28, %v1463_v37  ;;  %v1470_v61 = vmul.f32 %v3259_v55, %v1025_v50  ;;  %2595 = vst [vmem:[%s3961_s13 + $0x318] sm:$0xff] %v2200_v11  ;;  %vm1476_vm5 = vweird.f32 %v3259_v55 }
 0x47a   : > { %3260 = vrsqrt.f32 %v1026_v24  ;;  %vm1477_vm7 = vmor %vm1475_vm6, %vm1476_vm5  ;;  %vm1485_vm9 = vweird.f32 %v1026_v24 }
 0x47b   : > { %v1468_v36 = vsel %vm1467_vm4, %v3257_v28, %v1464_v47  ;;  %v1471_v4 = vmul.f32 %v3259_v55, %v1470_v61  ;;  %v2968_v20 = vld [vmem:[#allocation2 + $0x80] sm:$0xff] }
 0x47c   : > { %v1552_v45 = vmul.f32 %v1468_v36, %v4631_v32  ;;  %2217 = vmatmul.bf16.gmra.mxu1 %v2968_v20  ;;  %2346 = vmatmul.bf16.gmra.mxu2 %v2968_v20 }
 0x47d   : > { %v1472_v5 = vmul.f32 0.5, %v1471_v4  ;;  %2475 = vmatmul.bf16.gmra.mxu3 %v2968_v20  ;;  %v930_v35 = vpop.xlane.xlu1 %929 }
 0x47e   : > { %v1604_v6 = vmul.f32 %v4558_v40, %v1552_v45  ;;  %v2329_v8 = vpop.f32.mrf.mxu2  ;;  %v979_v9 = vmul.f32 %v930_v35, %v3457_v0 }
 0x47f   : > { %v1473_v21 = vsub.f32 1.5, %v1472_v5  ;;  %2596 = vst [vmem:[%s3961_s13 + $0x320] sm:$0xff] %v2329_v8  ;;  %v2458_v60 = vpop.f32.mrf.mxu3 }
 0x480   : > { %v3261_v13 = vpop.eup %3260  ;;  %v1656_v3 = vadd.f32 %v4607_v26, %v1604_v6  ;;  %2597 = vst [vmem:[%s3961_s13 + $0x328] sm:$0xff] %v2458_v60  ;;  %v2203_v57 = vpop.f32.mrf.mxu1  ;;  %v1027_v39 = vadd.f32 1e-05, %v979_v9 }
 0x481   : > { %v1474_v32 = vmul.f32 %v3259_v55, %v1473_v21  ;;  %v1480_v56 = vmul.f32 %v3261_v13, %v1026_v24  ;;  %2598 = vst [vmem:[%s3961_s13 + $0x330] sm:$0xff] %v2203_v57  ;;  %vm1486_vm8 = vweird.f32 %v3261_v13 }
 0x482   : > { %v3104_v51 = vpack.c.bf16 %v1656_v3, %v1655_v58  ;;  %vm1487_vm10 = vmor %vm1485_vm9, %vm1486_vm8  ;;  %3262 = vrsqrt.f32 %v1027_v39  ;;  %vm1495_vm12 = vweird.f32 %v1027_v39 }
 0x483   : > { %v1481_v53 = vmul.f32 %v3261_v13, %v1480_v56  ;;  %v1478_v23 = vsel %vm1477_vm7, %v3259_v55, %v1474_v32 }
 0x484   : > { %3136 = vst [vmem:[#allocation2 + $0xb8] sm:$0xff] %v3104_v51   ;;  %v1553_v34 = vmul.f32 %v1478_v23, %v4649_v52 }
 0x485   : > { %v1482_v2 = vmul.f32 0.5, %v1481_v53 }
 0x486   : > { %v2332_v12 = vpop.f32.mrf.mxu2  ;;  %v1605_v31 = vmul.f32 %v4558_v40, %v1553_v34 }
 0x487   : > { %v1483_v17 = vsub.f32 1.5, %v1482_v2  ;;  %2599 = vst [vmem:[%s3961_s13 + $0x338] sm:$0xff] %v2332_v12  ;;  %v2461_v44 = vpop.f32.mrf.mxu3 }
 0x488   : > { %2600 = vst [vmem:[%s3961_s13 + $0x340] sm:$0xff] %v2461_v44  ;;  %v2205_v63 = vpop.f32.mrf.mxu1  ;;  %v1657_v30 = vadd.f32 %v4607_v26, %v1605_v31  ;;  %v3263_v43 = vpop.eup %3262 }
 0x489   : > { %v1484_v29 = vmul.f32 %v3261_v13, %v1483_v17  ;;  %2601 = vst [vmem:[%s3961_s13 + $0x348] sm:$0xff] %v2205_v63  ;;  %v1490_v10 = vmul.f32 %v3263_v43, %v1027_v39  ;;  %vm1496_vm11 = vweird.f32 %v3263_v43 }
 0x48a   : > { %vm1497_vm13 = vmor %vm1495_vm12, %vm1496_vm11 }
 0x48b   : > { %v1488_v54 = vsel %vm1487_vm10, %v3261_v13, %v1484_v29  ;;  %v2969_v46 = vld [vmem:[#allocation2 + $0xb8] sm:$0xff]  ;;  %v1491_v49 = vmul.f32 %v3263_v43, %v1490_v10 }
 0x48c   : > { %v1554_v14 = vmul.f32 %v1488_v54, %v4660_v25  ;;  %2222 = vmatmul.bf16.gmra.mxu1 %v2969_v46  ;;  %2351 = vmatmul.bf16.gmra.mxu2 %v2969_v46 }
 0x48d   : > { %2480 = vmatmul.bf16.gmra.mxu3 %v2969_v46  ;;  %v1492_v27 = vmul.f32 0.5, %v1491_v49 }
 0x48e   : > { %v1606_v52 = vmul.f32 %v4558_v40, %v1554_v14  ;;  %v2334_v38 = vpop.f32.mrf.mxu2 }
 0x48f   : > { %2602 = vst [vmem:[%s3961_s13 + $0x350] sm:$0xff] %v2334_v38  ;;  %v2463_v59 = vpop.f32.mrf.mxu3  ;;  %v1493_v55 = vsub.f32 1.5, %v1492_v27 }
 0x490   : > { %v1658_v18 = vadd.f32 %v4607_v26, %v1606_v52  ;;  %2603 = vst [vmem:[%s3961_s13 + $0x358] sm:$0xff] %v2463_v59  ;;  %v2208_v16 = vpop.f32.mrf.mxu1 }
 0x491   : > { %2604 = vst [vmem:[%s3961_s13 + $0x360] sm:$0xff] %v2208_v16  ;;  %v1494_v24 = vmul.f32 %v3263_v43, %v1493_v55 }
 0x492   : > { %v3109_v25 = vpack.c.bf16 %v1658_v18, %v1657_v30 }
 0x493   : > { %v1498_v61 = vsel %vm1497_vm13, %v3263_v43, %v1494_v24 }
 0x494   : > { %3137 = vst [vmem:[#allocation2 + $0x20] sm:$0xff] %v3109_v25   ;;  %v1555_v20 = vmul.f32 %v1498_v61, %v4674_v1 }
 0x496   : > { %v2337_v28 = vpop.f32.mrf.mxu2  ;;  %v1607_v45 = vmul.f32 %v4558_v40, %v1555_v20 }
 0x497   : > { %2605 = vst [vmem:[%s3961_s13 + $0x368] sm:$0xff] %v2337_v28  ;;  %v2466_v15 = vpop.f32.mrf.mxu3 }
 0x498   : > { %2606 = vst [vmem:[%s3961_s13 + $0x370] sm:$0xff] %v2466_v15  ;;  %v2210_v19 = vpop.f32.mrf.mxu1  ;;  %v1659_v8 = vadd.f32 %v4607_v26, %v1607_v45 }
 0x499   : > { %2607 = vst [vmem:[%s3961_s13 + $0x378] sm:$0xff] %v2210_v19 }
 0x49b   : > { %v2970_v50 = vld [vmem:[#allocation2 + $0x20] sm:$0xff] }
 0x49c   : > { %2227 = vmatmul.bf16.gmra.mxu1 %v2970_v50  ;;  %2356 = vmatmul.bf16.gmra.mxu2 %v2970_v50 }
 0x49d   : > { %2485 = vmatmul.bf16.gmra.mxu3 %v2970_v50 }
 0x49e   : > { %v2339_v22 = vpop.f32.mrf.mxu2 }
 0x49f   : > { %2608 = vst [vmem:[%s3961_s13 + $0x380] sm:$0xff] %v2339_v22  ;;  %v2468_v41 = vpop.f32.mrf.mxu3 }
 0x4a0   : > { %2609 = vst [vmem:[%s3961_s13 + $0x388] sm:$0xff] %v2468_v41 }
 0x4cf   : > { %v932_v42 = vpop.xlane.xlu2 %931 }
 0x4d0   : > { %v980_v48 = vmul.f32 %v932_v42, %v3457_v0 }
 0x4d2   : > { %v1028_v37 = vadd.f32 1e-05, %v980_v48 }
 0x4d4   : > { %3264 = vrsqrt.f32 %v1028_v37  ;;  %vm1505_vm15 = vweird.f32 %v1028_v37 }
 0x4da   : > { %v3265_v33 = vpop.eup %3264 }
 0x4db   : > { %v1500_v11 = vmul.f32 %v3265_v33, %v1028_v37  ;;  %vm1506_vm14 = vweird.f32 %v3265_v33 }
 0x4dc   : > { %vm1507_vm0 = vmor %vm1505_vm15, %vm1506_vm14 }
 0x4dd   : > { %v1501_v47 = vmul.f32 %v3265_v33, %v1500_v11 }
 0x4df   : > { %v1502_v36 = vmul.f32 0.5, %v1501_v47 }
 0x4e1   : > { %v1503_v4 = vsub.f32 1.5, %v1502_v36 }
 0x4e3   : > { %v1504_v0 = vmul.f32 %v3265_v33, %v1503_v4 }
 0x4e5   : > { %v1508_v7 = vsel %vm1507_vm0, %v3265_v33, %v1504_v0 }
 0x4e6   : > { %v1556_v5 = vmul.f32 %v1508_v7, %v4693_v62 }
 0x4e8   : > { %v1608_v6 = vmul.f32 %v4558_v40, %v1556_v5 }
 0x4e9   : > { %v2213_v60 = vpop.f32.mrf.mxu1 }
 0x4ea   : > { %v1660_v21 = vadd.f32 %v4607_v26, %v1608_v6  ;;  %2610 = vst [vmem:[%s3961_s13 + $0x390] sm:$0xff] %v2213_v60 }
 0x4ec   : > { %v3114_v1 = vpack.c.bf16 %v1660_v21, %v1659_v8 }
 0x4ee   : > { %3138 = vst [vmem:[#allocation2 + $0x8] sm:$0xff] %v3114_v1  }
 0x4ef   : > { %v2342_v13 = vpop.f32.mrf.mxu2 }
 0x4f0   : > { %2611 = vst [vmem:[%s3961_s13 + $0x398] sm:$0xff] %v2342_v13  ;;  %v2471_v58 = vpop.f32.mrf.mxu3 }
 0x4f1   : > { %2612 = vst [vmem:[%s3961_s13 + $0x3a0] sm:$0xff] %v2471_v58  ;;  %v2215_v62 = vpop.f32.mrf.mxu1 }
 0x4f2   : > { %2613 = vst [vmem:[%s3961_s13 + $0x3a8] sm:$0xff] %v2215_v62 }
 0x4f5   : > { %v2971_v40 = vld [vmem:[#allocation2 + $0x8] sm:$0xff] }
 0x4f6   : > { %2232 = vmatmul.bf16.gmra.mxu1 %v2971_v40  ;;  %2361 = vmatmul.bf16.gmra.mxu2 %v2971_v40 }
 0x4f7   : > { %2490 = vmatmul.bf16.gmra.mxu3 %v2971_v40  ;;  %v2344_v26 = vpop.f32.mrf.mxu2 }
 0x4f8   : > { %2614 = vst [vmem:[%s3961_s13 + $0x3b0] sm:$0xff] %v2344_v26  ;;  %v2473_v3 = vpop.f32.mrf.mxu3 }
 0x4f9   : > { %2615 = vst [vmem:[%s3961_s13 + $0x3b8] sm:$0xff] %v2473_v3  ;;  %v2218_v57 = vpop.f32.mrf.mxu1 }
 0x4fa   : > { %2616 = vst [vmem:[%s3961_s13 + $0x3c0] sm:$0xff] %v2218_v57 }
 0x4ff   : > { %v2347_v32 = vpop.f32.mrf.mxu2 }
 0x500   : > { %2617 = vst [vmem:[%s3961_s13 + $0x3c8] sm:$0xff] %v2347_v32  ;;  %v2476_v56 = vpop.f32.mrf.mxu3 }
 0x501   : > { %2618 = vst [vmem:[%s3961_s13 + $0x3d0] sm:$0xff] %v2476_v56  ;;  %v2220_v51 = vpop.f32.mrf.mxu1 }
 0x502   : > { %2619 = vst [vmem:[%s3961_s13 + $0x3d8] sm:$0xff] %v2220_v51 }
 0x507   : > { %v2349_v53 = vpop.f32.mrf.mxu2 }
 0x508   : > { %2620 = vst [vmem:[%s3961_s13 + $0x3e0] sm:$0xff] %v2349_v53  ;;  %v2478_v23 = vpop.f32.mrf.mxu3 }
 0x509   : > { %2621 = vst [vmem:[%s3961_s13 + $0x3e8] sm:$0xff] %v2478_v23  ;;  %v2223_v2 = vpop.f32.mrf.mxu1 }
 0x50a   : > { %2622 = vst [vmem:[%s3961_s13 + $0x3f0] sm:$0xff] %v2223_v2 }
 0x50f   : > { %v2352_v12 = vpop.f32.mrf.mxu2 }
 0x510   : > { %2623 = vst [vmem:[%s3961_s13 + $0x3f8] sm:$0xff] %v2352_v12  ;;  %v2481_v17 = vpop.f32.mrf.mxu3 }
 0x511   : > { %2624 = vst [vmem:[%s3961_s13 + $0x400] sm:$0xff] %v2481_v17  ;;  %v2225_v44 = vpop.f32.mrf.mxu1 }
 0x512   : > { %2625 = vst [vmem:[%s3961_s13 + $0x408] sm:$0xff] %v2225_v44 }
 0x517   : > { %v2354_v34 = vpop.f32.mrf.mxu2 }
 0x518   : > { %2626 = vst [vmem:[%s3961_s13 + $0x410] sm:$0xff] %v2354_v34  ;;  %v2483_v63 = vpop.f32.mrf.mxu3 }
 0x519   : > { %2627 = vst [vmem:[%s3961_s13 + $0x418] sm:$0xff] %v2483_v63  ;;  %v2228_v29 = vpop.f32.mrf.mxu1 }
 0x51a   : > { %2628 = vst [vmem:[%s3961_s13 + $0x420] sm:$0xff] %v2228_v29 }
 0x51f   : > { %v2357_v54 = vpop.f32.mrf.mxu2 }
 0x520   : > { %2629 = vst [vmem:[%s3961_s13 + $0x428] sm:$0xff] %v2357_v54  ;;  %v2486_v46 = vpop.f32.mrf.mxu3 }
 0x521   : > { %2630 = vst [vmem:[%s3961_s13 + $0x430] sm:$0xff] %v2486_v46  ;;  %v2230_v31 = vpop.f32.mrf.mxu1 }
 0x522   : > { %2631 = vst [vmem:[%s3961_s13 + $0x438] sm:$0xff] %v2230_v31 }
 0x527   : > { %v2359_v14 = vpop.f32.mrf.mxu2 }
 0x528   : > { %2632 = vst [vmem:[%s3961_s13 + $0x440] sm:$0xff] %v2359_v14  ;;  %v2488_v52 = vpop.f32.mrf.mxu3 }
 0x529   : > { %2633 = vst [vmem:[%s3961_s13 + $0x448] sm:$0xff] %v2488_v52 }
 0x573   : > { %v2233_v38 = vpop.f32.mrf.mxu1 }
 0x574   : > { %2634 = vst [vmem:[%s3961_s13 + $0x450] sm:$0xff] %v2233_v38 }
 0x579   : > { %v2362_v59 = vpop.f32.mrf.mxu2 }
 0x57a   : > { %2635 = vst [vmem:[%s3961_s13 + $0x458] sm:$0xff] %v2362_v59  ;;  %v2491_v30 = vpop.f32.mrf.mxu3 }
 0x57b   : > { %2636 = vst [vmem:[%s3961_s13 + $0x460] sm:$0xff] %v2491_v30  ;;  %v2235_v18 = vpop.f32.mrf.mxu1 }
 0x57c   : > { %2637 = vst [vmem:[%s3961_s13 + $0x468] sm:$0xff] %v2235_v18 }
 0x581   : > { %v2364_v16 = vpop.f32.mrf.mxu2 }
 0x582   : > { %2638 = vst [vmem:[%s3961_s13 + $0x470] sm:$0xff] %v2364_v16  ;;  %v2493_v25 = vpop.f32.mrf.mxu3 }
 0x583   : > { %2639 = vst [vmem:[%s3961_s13 + $0x478] sm:$0xff] %v2493_v25 }
 0x584 PF: > { %s16_s23 = sadd.s32 1, %s3294_s23   ;;  %s4817_s21 = smov %s3290_s22 }
 0x585   : > { %p13_p5 = scmp.ge.s32.totalorder %s16_s23, 4   ;;  %s4818_s22 = smov %s4820_s24 }
 0x587   :  { %15 = sbr.rel (!%p13_p5) target bundleno = 2 (0x2), region = 78 }

</bundles_post_ra>
